<compile_context>
chip_gen: v6e
topology: v6e:2x2x1
jax: 0.10.0
libtpu: 0.0.40
codegen_flags: <defaults>
</compile_context>

<pallas_src>
import functools

import jax
import jax.numpy as jnp
from jax.experimental import pallas as pl
from jax.experimental.pallas import tpu as pltpu

INPUT_SIZE = 75
HIDDEN_SIZE = 128
NUM_CLASSES = 10

LANE = 128
SUBLANE = 8


def _round_up(n, m):
    return (n + m - 1) // m * m


def lstm_fc_kernel(x_ref, wih_ref, whh_ref, b_ref, wfc_ref, bfc_ref,
                   out_ref, h_scr, c_scr, *, seq_len, chunk, batch, hidden,
                   ragged):
    H = hidden
    t = pl.program_id(0)

    @pl.when(t == 0)
    def _():
        h_scr[...] = jnp.zeros_like(h_scr)
        c_scr[...] = jnp.zeros_like(c_scr)

    # Per-chunk hoisted input projection (one MXU matmul for all chunk steps):
    #   (B*chunk, I) @ (I, 4H) + (b_ih + b_hh)  ->  f32 (B, chunk, 4H)
    xb = x_ref[...].astype(jnp.bfloat16)                       # (B, chunk, I)
    xp = (jnp.dot(xb.reshape(batch * chunk, -1), wih_ref[...],
                  preferred_element_type=jnp.float32)
          + b_ref[...]).reshape(batch, chunk, 4 * H)

    whh = whh_ref[...]          # (H, 4H) bf16, hoisted out of the step loop
    h = h_scr[...]              # (B, H) bf16 carried state
    c = c_scr[...]              # (B, H) f32 carried state

    for s in range(chunk):
        gates = xp[:, s, :] + jnp.dot(h, whh,
                                      preferred_element_type=jnp.float32)
        # PyTorch gate order: input, forget, cell(g), output.
        # sigmoid(x) == 0.5*(1 + tanh(0.5*x)); i and f share one contiguous
        # tanh slab -> 3 EUP transcendental slabs per step.
        sig_if = 0.5 * (1.0 + jnp.tanh(0.5 * gates[:, 0:2 * H]))
        i_g = sig_if[:, 0:H]
        f_g = sig_if[:, H:2 * H]
        g_g = jnp.tanh(gates[:, 2 * H:3 * H])
        o_g = 0.5 * (1.0 + jnp.tanh(0.5 * gates[:, 3 * H:4 * H]))
        c_new = f_g * c + i_g * g_g
        h_new = (o_g * jnp.tanh(c_new)).astype(jnp.bfloat16)
        if ragged:
            # Zero-padded tail steps (T padded up to a chunk multiple) must not
            # update the carried state.
            valid = (t * chunk + s) < seq_len
            c = jnp.where(valid, c_new, c)
            h = jnp.where(valid, h_new, h)
        else:
            c, h = c_new, h_new

    h_scr[...] = h
    c_scr[...] = c

    @pl.when(t == pl.num_programs(0) - 1)
    def _():
        # FC head on the final hidden state; lane-dense (B, 128) output.
        out_ref[...] = (
            jnp.dot(h, wfc_ref[...], preferred_element_type=jnp.float32)
            + bfc_ref[...]
        ).astype(out_ref.dtype)


def lstm_model_forward(x, params, *, chunk=8):
    """x: (B, T, I) float32.  Returns (B, 10)."""
    B, T, I = x.shape
    H = HIDDEN_SIZE
    NC_pad = _round_up(NUM_CLASSES, LANE)

    # Chunk of time steps processed per grid iteration. The chunk dim is the
    # second-minor dim of the x block, so it must be a sublane multiple unless
    # it equals the full T extent.
    chunk = min(chunk, T)
    if chunk != T:
        chunk = _round_up(chunk, SUBLANE)
    num_chunks = pl.cdiv(T, chunk)
    T_pad = num_chunks * chunk
    ragged = T_pad != T
    if ragged:
        x = jnp.pad(x, ((0, 0), (0, T_pad - T), (0, 0)))

    # Weights: one-time tiny casts; matmul inputs bf16 with f32 accumulation.
    wih_t = params["w_ih"].T.astype(jnp.bfloat16)                  # (I, 4H)
    whh_t = params["w_hh"].T.astype(jnp.bfloat16)                  # (H, 4H)
    b = (params["b_ih"] + params["b_hh"]).reshape(1, 4 * H).astype(jnp.float32)
    wfc_t = jnp.pad(params["w_fc"].T,
                    ((0, 0), (0, NC_pad - NUM_CLASSES))).astype(jnp.bfloat16)
    bfc = jnp.pad(params["b_fc"],
                  (0, NC_pad - NUM_CLASSES)).reshape(1, NC_pad).astype(jnp.float32)

    kernel = functools.partial(lstm_fc_kernel, seq_len=T, chunk=chunk,
                               batch=B, hidden=H, ragged=ragged)

    out_pad = pl.pallas_call(
        kernel,
        out_shape=jax.ShapeDtypeStruct((B, NC_pad), jnp.float32),
        grid_spec=pltpu.PrefetchScalarGridSpec(
            num_scalar_prefetch=0,
            grid=(num_chunks,),
            in_specs=[
                # x in natural (B, T, I) layout, chunked along T.
                pl.BlockSpec((B, chunk, I), lambda t: (0, t, 0)),
                pl.BlockSpec((I, 4 * H), lambda t: (0, 0)),
                pl.BlockSpec((H, 4 * H), lambda t: (0, 0)),
                pl.BlockSpec((1, 4 * H), lambda t: (0, 0)),
                pl.BlockSpec((H, NC_pad), lambda t: (0, 0)),
                pl.BlockSpec((1, NC_pad), lambda t: (0, 0)),
            ],
            out_specs=pl.BlockSpec((B, NC_pad), lambda t: (0, 0)),
            scratch_shapes=[
                pltpu.VMEM((B, H), jnp.bfloat16),   # h carried across chunks
                pltpu.VMEM((B, H), jnp.float32),    # c carried across chunks
            ],
        ),
        compiler_params=pltpu.CompilerParams(
            dimension_semantics=("arbitrary",),
            # Actual usage (weights + double-buffered chunk + scratch) is well
            # under 1 MiB; this limit is safe on v5e/v6e/v7x.
            vmem_limit_bytes=32 * 1024 * 1024,
        ),
    )(x, wih_t, whh_t, b, wfc_t, bfc)

    return out_pad[:, :NUM_CLASSES].astype(x.dtype)


def reference_forward(x, params):
    """Pure-JAX f32 reference (lax.scan LSTM + linear head), PyTorch semantics."""
    B, T, I = x.shape
    H = HIDDEN_SIZE
    b = params["b_ih"] + params["b_hh"]

    def step(carry, x_t):
        h, c = carry
        gates = x_t @ params["w_ih"].T + h @ params["w_hh"].T + b
        i = jax.nn.sigmoid(gates[:, 0 * H:1 * H])
        f = jax.nn.sigmoid(gates[:, 1 * H:2 * H])
        g = jnp.tanh(gates[:, 2 * H:3 * H])
        o = jax.nn.sigmoid(gates[:, 3 * H:4 * H])
        c = f * c + i * g
        h = o * jnp.tanh(c)
        return (h, c), None

    h0 = jnp.zeros((B, H), jnp.float32)
    c0 = jnp.zeros((B, H), jnp.float32)
    (h_n, _), _ = jax.lax.scan(step, (h0, c0), jnp.transpose(x, (1, 0, 2)))
    return h_n @ params["w_fc"].T + params["b_fc"]


def init_params(key):
    """Deterministic init matching PyTorch LSTM/Linear shapes (uniform +-1/sqrt(H))."""
    H, I = HIDDEN_SIZE, INPUT_SIZE
    k = 1.0 / jnp.sqrt(jnp.float32(H))
    ks = jax.random.split(key, 6)
    return {
        "w_ih": jax.random.uniform(ks[0], (4 * H, I), jnp.float32, -k, k),
        "w_hh": jax.random.uniform(ks[1], (4 * H, H), jnp.float32, -k, k),
        "b_ih": jax.random.uniform(ks[2], (4 * H,), jnp.float32, -k, k),
        "b_hh": jax.random.uniform(ks[3], (4 * H,), jnp.float32, -k, k),
        "w_fc": jax.random.uniform(ks[4], (NUM_CLASSES, H), jnp.float32, -k, k),
        "b_fc": jax.random.uniform(ks[5], (NUM_CLASSES,), jnp.float32, -k, k),
    }


if __name__ == "__main__":
    key = jax.random.PRNGKey(0)
    pkey, xkey = jax.random.split(key)
    params = init_params(pkey)

    B, T = 2, 8
    x = jax.random.normal(xkey, (B, T, INPUT_SIZE), jnp.float32)

    out = jax.block_until_ready(lstm_model_forward(x, params))
    ref = jax.block_until_ready(reference_forward(x, params))

    assert out.shape == (B, NUM_CLASSES)
    # bf16 matmul inputs / bf16-carried h (f32 MXU accumulation, f32 c) ->
    # slightly looser tolerance vs the f32 reference.
    assert jnp.allclose(out, ref, atol=2e-2, rtol=2e-2), (out, ref)
    print("KERNEL_OK")
</pallas_src>

<mosaic_0001>
module attributes {stable_mosaic.version = 11 : i64} {
  func.func @lstm_fc_kernel(%arg0: i32, %arg1: memref<2x8x75xf32, #tpu.memory_space<vmem>>, %arg2: memref<75x512xbf16, #tpu.memory_space<vmem>>, %arg3: memref<128x512xbf16, #tpu.memory_space<vmem>>, %arg4: memref<1x512xf32, #tpu.memory_space<vmem>>, %arg5: memref<128x128xbf16, #tpu.memory_space<vmem>>, %arg6: memref<1x128xf32, #tpu.memory_space<vmem>>, %arg7: memref<2x128xf32, #tpu.memory_space<vmem>>, %arg8: memref<2x128xbf16, #tpu.memory_space<vmem>>, %arg9: memref<2x128xf32, #tpu.memory_space<vmem>>) attributes {dimension_semantics = [#tpu.dimension_semantics<arbitrary>], iteration_bounds = array<i64: 1>, scalar_prefetch = 0 : i64, scratch_operands = 2 : i64, tpu.core_type = #tpu.core_type<tc>, window_params = [{transform_indices = @transform_0, window_bounds = array<i64: 2, 8, 75>}, {pipeline_mode = #tpu.pipeline_mode<synchronous>, transform_indices = @transform_1, window_bounds = array<i64: 75, 512>}, {pipeline_mode = #tpu.pipeline_mode<synchronous>, transform_indices = @transform_2, window_bounds = array<i64: 128, 512>}, {pipeline_mode = #tpu.pipeline_mode<synchronous>, transform_indices = @transform_3, window_bounds = array<i64: 1, 512>}, {pipeline_mode = #tpu.pipeline_mode<synchronous>, transform_indices = @transform_4, window_bounds = array<i64: 128, 128>}, {pipeline_mode = #tpu.pipeline_mode<synchronous>, transform_indices = @transform_5, window_bounds = array<i64: 1, 128>}, {pipeline_mode = #tpu.pipeline_mode<synchronous>, transform_indices = @transform_6, window_bounds = array<i64: 2, 128>}]} {
    %c0_i32 = arith.constant 0 : i32
    %0 = arith.cmpi eq, %arg0, %c0_i32 : i32
    %1 = arith.extui %0 : i1 to i32
    %c0_i32_0 = arith.constant 0 : i32
    %2 = arith.cmpi ne, %1, %c0_i32_0 : i32
    scf.if %2 {
      %cst_75 = arith.constant 0.000000e+00 : bf16
      %260 = vector.broadcast %cst_75 : bf16 to vector<2x128xbf16>
      %c0_76 = arith.constant 0 : index
      %c0_77 = arith.constant 0 : index
      %261 = vector.load %arg8[%c0_76, %c0_77] : memref<2x128xbf16, #tpu.memory_space<vmem>>, vector<2x128xbf16>
      tpu.vector_store %arg8[%c0_76, %c0_77], %260 {strides = array<i32>} : memref<2x128xbf16, #tpu.memory_space<vmem>>, vector<2x128xbf16>,
      %cst_78 = arith.constant 0.000000e+00 : f32
      %262 = vector.broadcast %cst_78 : f32 to vector<2x128xf32>
      %c0_79 = arith.constant 0 : index
      %c0_80 = arith.constant 0 : index
      %263 = vector.load %arg9[%c0_79, %c0_80] : memref<2x128xf32, #tpu.memory_space<vmem>>, vector<2x128xf32>
      tpu.vector_store %arg9[%c0_79, %c0_80], %262 {strides = array<i32>} : memref<2x128xf32, #tpu.memory_space<vmem>>, vector<2x128xf32>,
    } else {
    }
    %c0 = arith.constant 0 : index
    %c0_1 = arith.constant 0 : index
    %c0_2 = arith.constant 0 : index
    %3 = vector.load %arg1[%c0, %c0_1, %c0_2] : memref<2x8x75xf32, #tpu.memory_space<vmem>>, vector<2x8x75xf32>
    %4 = arith.truncf %3 : vector<2x8x75xf32> to vector<2x8x75xbf16>
    %5 = vector.shape_cast %4 : vector<2x8x75xbf16> to vector<16x75xbf16>
    %c0_3 = arith.constant 0 : index
    %c0_4 = arith.constant 0 : index
    %6 = vector.load %arg2[%c0_3, %c0_4] : memref<75x512xbf16, #tpu.memory_space<vmem>>, vector<75x512xbf16>
    %cst = arith.constant dense<0.000000e+00> : vector<16x512xf32>
    %7 = tpu.matmul %5, %6, %cst {dimension_numbers = #tpu.dot_dimension_numbers<[1], [0], [0], [1], [0, 0, 1, 1], [], []>} : vector<16x75xbf16>, vector<75x512xbf16>, vector<16x512xf32> -> vector<16x512xf32>
    %c0_5 = arith.constant 0 : index
    %c0_6 = arith.constant 0 : index
    %8 = vector.load %arg4[%c0_5, %c0_6] : memref<1x512xf32, #tpu.memory_space<vmem>>, vector<1x512xf32>
    %9 = vector.broadcast %8 : vector<1x512xf32> to vector<16x512xf32>
    %10 = arith.addf %7, %9 : vector<16x512xf32>
    %11 = vector.shape_cast %10 : vector<16x512xf32> to vector<2x8x512xf32>
    %c0_7 = arith.constant 0 : index
    %c0_8 = arith.constant 0 : index
    %12 = vector.load %arg3[%c0_7, %c0_8] : memref<128x512xbf16, #tpu.memory_space<vmem>>, vector<128x512xbf16>
    %c0_9 = arith.constant 0 : index
    %c0_10 = arith.constant 0 : index
    %13 = vector.load %arg8[%c0_9, %c0_10] : memref<2x128xbf16, #tpu.memory_space<vmem>>, vector<2x128xbf16>
    %c0_11 = arith.constant 0 : index
    %c0_12 = arith.constant 0 : index
    %14 = vector.load %arg9[%c0_11, %c0_12] : memref<2x128xf32, #tpu.memory_space<vmem>>, vector<2x128xf32>
    %15 = vector.extract_strided_slice %11 {offsets = [0, 0, 0], sizes = [2, 1, 512], strides = [1, 1, 1]} : vector<2x8x512xf32> to vector<2x1x512xf32>
    %16 = vector.shape_cast %15 : vector<2x1x512xf32> to vector<2x512xf32>
    %cst_13 = arith.constant dense<0.000000e+00> : vector<2x512xf32>
    %17 = tpu.matmul %13, %12, %cst_13 {dimension_numbers = #tpu.dot_dimension_numbers<[1], [0], [0], [1], [0, 0, 1, 1], [], []>} : vector<2x128xbf16>, vector<128x512xbf16>, vector<2x512xf32> -> vector<2x512xf32>
    %18 = arith.addf %16, %17 : vector<2x512xf32>
    %19 = vector.extract_strided_slice %18 {offsets = [0, 0], sizes = [2, 256], strides = [1, 1]} : vector<2x512xf32> to vector<2x256xf32>
    %cst_14 = arith.constant 5.000000e-01 : f32
    %20 = vector.broadcast %cst_14 : f32 to vector<2x256xf32>
    %21 = arith.mulf %20, %19 : vector<2x256xf32>
    %22 = math.tanh %21 : vector<2x256xf32>
    %cst_15 = arith.constant 1.000000e+00 : f32
    %23 = vector.broadcast %cst_15 : f32 to vector<2x256xf32>
    %24 = arith.addf %23, %22 : vector<2x256xf32>
    %cst_16 = arith.constant 5.000000e-01 : f32
    %25 = vector.broadcast %cst_16 : f32 to vector<2x256xf32>
    %26 = arith.mulf %25, %24 : vector<2x256xf32>
    %27 = vector.extract_strided_slice %26 {offsets = [0, 0], sizes = [2, 128], strides = [1, 1]} : vector<2x256xf32> to vector<2x128xf32>
    %28 = vector.extract_strided_slice %26 {offsets = [0, 128], sizes = [2, 128], strides = [1, 1]} : vector<2x256xf32> to vector<2x128xf32>
    %29 = vector.extract_strided_slice %18 {offsets = [0, 256], sizes = [2, 128], strides = [1, 1]} : vector<2x512xf32> to vector<2x128xf32>
    %30 = math.tanh %29 : vector<2x128xf32>
    %31 = vector.extract_strided_slice %18 {offsets = [0, 384], sizes = [2, 128], strides = [1, 1]} : vector<2x512xf32> to vector<2x128xf32>
    %cst_17 = arith.constant 5.000000e-01 : f32
    %32 = vector.broadcast %cst_17 : f32 to vector<2x128xf32>
    %33 = arith.mulf %32, %31 : vector<2x128xf32>
    %34 = math.tanh %33 : vector<2x128xf32>
    %cst_18 = arith.constant 1.000000e+00 : f32
    %35 = vector.broadcast %cst_18 : f32 to vector<2x128xf32>
    %36 = arith.addf %35, %34 : vector<2x128xf32>
    %cst_19 = arith.constant 5.000000e-01 : f32
    %37 = vector.broadcast %cst_19 : f32 to vector<2x128xf32>
    %38 = arith.mulf %37, %36 : vector<2x128xf32>
    %39 = arith.mulf %28, %14 : vector<2x128xf32>
    %40 = arith.mulf %27, %30 : vector<2x128xf32>
    %41 = arith.addf %39, %40 : vector<2x128xf32>
    %42 = math.tanh %41 : vector<2x128xf32>
    %43 = arith.mulf %38, %42 : vector<2x128xf32>
    %44 = arith.truncf %43 : vector<2x128xf32> to vector<2x128xbf16>
    %45 = vector.extract_strided_slice %11 {offsets = [0, 1, 0], sizes = [2, 1, 512], strides = [1, 1, 1]} : vector<2x8x512xf32> to vector<2x1x512xf32>
    %46 = vector.shape_cast %45 : vector<2x1x512xf32> to vector<2x512xf32>
    %cst_20 = arith.constant dense<0.000000e+00> : vector<2x512xf32>
    %47 = tpu.matmul %44, %12, %cst_20 {dimension_numbers = #tpu.dot_dimension_numbers<[1], [0], [0], [1], [0, 0, 1, 1], [], []>} : vector<2x128xbf16>, vector<128x512xbf16>, vector<2x512xf32> -> vector<2x512xf32>
    %48 = arith.addf %46, %47 : vector<2x512xf32>
    %49 = vector.extract_strided_slice %48 {offsets = [0, 0], sizes = [2, 256], strides = [1, 1]} : vector<2x512xf32> to vector<2x256xf32>
    %cst_21 = arith.constant 5.000000e-01 : f32
    %50 = vector.broadcast %cst_21 : f32 to vector<2x256xf32>
    %51 = arith.mulf %50, %49 : vector<2x256xf32>
    %52 = math.tanh %51 : vector<2x256xf32>
    %cst_22 = arith.constant 1.000000e+00 : f32
    %53 = vector.broadcast %cst_22 : f32 to vector<2x256xf32>
    %54 = arith.addf %53, %52 : vector<2x256xf32>
    %cst_23 = arith.constant 5.000000e-01 : f32
    %55 = vector.broadcast %cst_23 : f32 to vector<2x256xf32>
    %56 = arith.mulf %55, %54 : vector<2x256xf32>
    %57 = vector.extract_strided_slice %56 {offsets = [0, 0], sizes = [2, 128], strides = [1, 1]} : vector<2x256xf32> to vector<2x128xf32>
    %58 = vector.extract_strided_slice %56 {offsets = [0, 128], sizes = [2, 128], strides = [1, 1]} : vector<2x256xf32> to vector<2x128xf32>
    %59 = vector.extract_strided_slice %48 {offsets = [0, 256], sizes = [2, 128], strides = [1, 1]} : vector<2x512xf32> to vector<2x128xf32>
    %60 = math.tanh %59 : vector<2x128xf32>
    %61 = vector.extract_strided_slice %48 {offsets = [0, 384], sizes = [2, 128], strides = [1, 1]} : vector<2x512xf32> to vector<2x128xf32>
    %cst_24 = arith.constant 5.000000e-01 : f32
    %62 = vector.broadcast %cst_24 : f32 to vector<2x128xf32>
    %63 = arith.mulf %62, %61 : vector<2x128xf32>
    %64 = math.tanh %63 : vector<2x128xf32>
    %cst_25 = arith.constant 1.000000e+00 : f32
    %65 = vector.broadcast %cst_25 : f32 to vector<2x128xf32>
    %66 = arith.addf %65, %64 : vector<2x128xf32>
    %cst_26 = arith.constant 5.000000e-01 : f32
    %67 = vector.broadcast %cst_26 : f32 to vector<2x128xf32>
    %68 = arith.mulf %67, %66 : vector<2x128xf32>
    %69 = arith.mulf %58, %41 : vector<2x128xf32>
    %70 = arith.mulf %57, %60 : vector<2x128xf32>
    %71 = arith.addf %69, %70 : vector<2x128xf32>
    %72 = math.tanh %71 : vector<2x128xf32>
    %73 = arith.mulf %68, %72 : vector<2x128xf32>
    %74 = arith.truncf %73 : vector<2x128xf32> to vector<2x128xbf16>
    %75 = vector.extract_strided_slice %11 {offsets = [0, 2, 0], sizes = [2, 1, 512], strides = [1, 1, 1]} : vector<2x8x512xf32> to vector<2x1x512xf32>
    %76 = vector.shape_cast %75 : vector<2x1x512xf32> to vector<2x512xf32>
    %cst_27 = arith.constant dense<0.000000e+00> : vector<2x512xf32>
    %77 = tpu.matmul %74, %12, %cst_27 {dimension_numbers = #tpu.dot_dimension_numbers<[1], [0], [0], [1], [0, 0, 1, 1], [], []>} : vector<2x128xbf16>, vector<128x512xbf16>, vector<2x512xf32> -> vector<2x512xf32>
    %78 = arith.addf %76, %77 : vector<2x512xf32>
    %79 = vector.extract_strided_slice %78 {offsets = [0, 0], sizes = [2, 256], strides = [1, 1]} : vector<2x512xf32> to vector<2x256xf32>
    %cst_28 = arith.constant 5.000000e-01 : f32
    %80 = vector.broadcast %cst_28 : f32 to vector<2x256xf32>
    %81 = arith.mulf %80, %79 : vector<2x256xf32>
    %82 = math.tanh %81 : vector<2x256xf32>
    %cst_29 = arith.constant 1.000000e+00 : f32
    %83 = vector.broadcast %cst_29 : f32 to vector<2x256xf32>
    %84 = arith.addf %83, %82 : vector<2x256xf32>
    %cst_30 = arith.constant 5.000000e-01 : f32
    %85 = vector.broadcast %cst_30 : f32 to vector<2x256xf32>
    %86 = arith.mulf %85, %84 : vector<2x256xf32>
    %87 = vector.extract_strided_slice %86 {offsets = [0, 0], sizes = [2, 128], strides = [1, 1]} : vector<2x256xf32> to vector<2x128xf32>
    %88 = vector.extract_strided_slice %86 {offsets = [0, 128], sizes = [2, 128], strides = [1, 1]} : vector<2x256xf32> to vector<2x128xf32>
    %89 = vector.extract_strided_slice %78 {offsets = [0, 256], sizes = [2, 128], strides = [1, 1]} : vector<2x512xf32> to vector<2x128xf32>
    %90 = math.tanh %89 : vector<2x128xf32>
    %91 = vector.extract_strided_slice %78 {offsets = [0, 384], sizes = [2, 128], strides = [1, 1]} : vector<2x512xf32> to vector<2x128xf32>
    %cst_31 = arith.constant 5.000000e-01 : f32
    %92 = vector.broadcast %cst_31 : f32 to vector<2x128xf32>
    %93 = arith.mulf %92, %91 : vector<2x128xf32>
    %94 = math.tanh %93 : vector<2x128xf32>
    %cst_32 = arith.constant 1.000000e+00 : f32
    %95 = vector.broadcast %cst_32 : f32 to vector<2x128xf32>
    %96 = arith.addf %95, %94 : vector<2x128xf32>
    %cst_33 = arith.constant 5.000000e-01 : f32
    %97 = vector.broadcast %cst_33 : f32 to vector<2x128xf32>
    %98 = arith.mulf %97, %96 : vector<2x128xf32>
    %99 = arith.mulf %88, %71 : vector<2x128xf32>
    %100 = arith.mulf %87, %90 : vector<2x128xf32>
    %101 = arith.addf %99, %100 : vector<2x128xf32>
    %102 = math.tanh %101 : vector<2x128xf32>
    %103 = arith.mulf %98, %102 : vector<2x128xf32>
    %104 = arith.truncf %103 : vector<2x128xf32> to vector<2x128xbf16>
    %105 = vector.extract_strided_slice %11 {offsets = [0, 3, 0], sizes = [2, 1, 512], strides = [1, 1, 1]} : vector<2x8x512xf32> to vector<2x1x512xf32>
    %106 = vector.shape_cast %105 : vector<2x1x512xf32> to vector<2x512xf32>
    %cst_34 = arith.constant dense<0.000000e+00> : vector<2x512xf32>
    %107 = tpu.matmul %104, %12, %cst_34 {dimension_numbers = #tpu.dot_dimension_numbers<[1], [0], [0], [1], [0, 0, 1, 1], [], []>} : vector<2x128xbf16>, vector<128x512xbf16>, vector<2x512xf32> -> vector<2x512xf32>
    %108 = arith.addf %106, %107 : vector<2x512xf32>
    %109 = vector.extract_strided_slice %108 {offsets = [0, 0], sizes = [2, 256], strides = [1, 1]} : vector<2x512xf32> to vector<2x256xf32>
    %cst_35 = arith.constant 5.000000e-01 : f32
    %110 = vector.broadcast %cst_35 : f32 to vector<2x256xf32>
    %111 = arith.mulf %110, %109 : vector<2x256xf32>
    %112 = math.tanh %111 : vector<2x256xf32>
    %cst_36 = arith.constant 1.000000e+00 : f32
    %113 = vector.broadcast %cst_36 : f32 to vector<2x256xf32>
    %114 = arith.addf %113, %112 : vector<2x256xf32>
    %cst_37 = arith.constant 5.000000e-01 : f32
    %115 = vector.broadcast %cst_37 : f32 to vector<2x256xf32>
    %116 = arith.mulf %115, %114 : vector<2x256xf32>
    %117 = vector.extract_strided_slice %116 {offsets = [0, 0], sizes = [2, 128], strides = [1, 1]} : vector<2x256xf32> to vector<2x128xf32>
    %118 = vector.extract_strided_slice %116 {offsets = [0, 128], sizes = [2, 128], strides = [1, 1]} : vector<2x256xf32> to vector<2x128xf32>
    %119 = vector.extract_strided_slice %108 {offsets = [0, 256], sizes = [2, 128], strides = [1, 1]} : vector<2x512xf32> to vector<2x128xf32>
    %120 = math.tanh %119 : vector<2x128xf32>
    %121 = vector.extract_strided_slice %108 {offsets = [0, 384], sizes = [2, 128], strides = [1, 1]} : vector<2x512xf32> to vector<2x128xf32>
    %cst_38 = arith.constant 5.000000e-01 : f32
    %122 = vector.broadcast %cst_38 : f32 to vector<2x128xf32>
    %123 = arith.mulf %122, %121 : vector<2x128xf32>
    %124 = math.tanh %123 : vector<2x128xf32>
    %cst_39 = arith.constant 1.000000e+00 : f32
    %125 = vector.broadcast %cst_39 : f32 to vector<2x128xf32>
    %126 = arith.addf %125, %124 : vector<2x128xf32>
    %cst_40 = arith.constant 5.000000e-01 : f32
    %127 = vector.broadcast %cst_40 : f32 to vector<2x128xf32>
    %128 = arith.mulf %127, %126 : vector<2x128xf32>
    %129 = arith.mulf %118, %101 : vector<2x128xf32>
    %130 = arith.mulf %117, %120 : vector<2x128xf32>
    %131 = arith.addf %129, %130 : vector<2x128xf32>
    %132 = math.tanh %131 : vector<2x128xf32>
    %133 = arith.mulf %128, %132 : vector<2x128xf32>
    %134 = arith.truncf %133 : vector<2x128xf32> to vector<2x128xbf16>
    %135 = vector.extract_strided_slice %11 {offsets = [0, 4, 0], sizes = [2, 1, 512], strides = [1, 1, 1]} : vector<2x8x512xf32> to vector<2x1x512xf32>
    %136 = vector.shape_cast %135 : vector<2x1x512xf32> to vector<2x512xf32>
    %cst_41 = arith.constant dense<0.000000e+00> : vector<2x512xf32>
    %137 = tpu.matmul %134, %12, %cst_41 {dimension_numbers = #tpu.dot_dimension_numbers<[1], [0], [0], [1], [0, 0, 1, 1], [], []>} : vector<2x128xbf16>, vector<128x512xbf16>, vector<2x512xf32> -> vector<2x512xf32>
    %138 = arith.addf %136, %137 : vector<2x512xf32>
    %139 = vector.extract_strided_slice %138 {offsets = [0, 0], sizes = [2, 256], strides = [1, 1]} : vector<2x512xf32> to vector<2x256xf32>
    %cst_42 = arith.constant 5.000000e-01 : f32
    %140 = vector.broadcast %cst_42 : f32 to vector<2x256xf32>
    %141 = arith.mulf %140, %139 : vector<2x256xf32>
    %142 = math.tanh %141 : vector<2x256xf32>
    %cst_43 = arith.constant 1.000000e+00 : f32
    %143 = vector.broadcast %cst_43 : f32 to vector<2x256xf32>
    %144 = arith.addf %143, %142 : vector<2x256xf32>
    %cst_44 = arith.constant 5.000000e-01 : f32
    %145 = vector.broadcast %cst_44 : f32 to vector<2x256xf32>
    %146 = arith.mulf %145, %144 : vector<2x256xf32>
    %147 = vector.extract_strided_slice %146 {offsets = [0, 0], sizes = [2, 128], strides = [1, 1]} : vector<2x256xf32> to vector<2x128xf32>
    %148 = vector.extract_strided_slice %146 {offsets = [0, 128], sizes = [2, 128], strides = [1, 1]} : vector<2x256xf32> to vector<2x128xf32>
    %149 = vector.extract_strided_slice %138 {offsets = [0, 256], sizes = [2, 128], strides = [1, 1]} : vector<2x512xf32> to vector<2x128xf32>
    %150 = math.tanh %149 : vector<2x128xf32>
    %151 = vector.extract_strided_slice %138 {offsets = [0, 384], sizes = [2, 128], strides = [1, 1]} : vector<2x512xf32> to vector<2x128xf32>
    %cst_45 = arith.constant 5.000000e-01 : f32
    %152 = vector.broadcast %cst_45 : f32 to vector<2x128xf32>
    %153 = arith.mulf %152, %151 : vector<2x128xf32>
    %154 = math.tanh %153 : vector<2x128xf32>
    %cst_46 = arith.constant 1.000000e+00 : f32
    %155 = vector.broadcast %cst_46 : f32 to vector<2x128xf32>
    %156 = arith.addf %155, %154 : vector<2x128xf32>
    %cst_47 = arith.constant 5.000000e-01 : f32
    %157 = vector.broadcast %cst_47 : f32 to vector<2x128xf32>
    %158 = arith.mulf %157, %156 : vector<2x128xf32>
    %159 = arith.mulf %148, %131 : vector<2x128xf32>
    %160 = arith.mulf %147, %150 : vector<2x128xf32>
    %161 = arith.addf %159, %160 : vector<2x128xf32>
    %162 = math.tanh %161 : vector<2x128xf32>
    %163 = arith.mulf %158, %162 : vector<2x128xf32>
    %164 = arith.truncf %163 : vector<2x128xf32> to vector<2x128xbf16>
    %165 = vector.extract_strided_slice %11 {offsets = [0, 5, 0], sizes = [2, 1, 512], strides = [1, 1, 1]} : vector<2x8x512xf32> to vector<2x1x512xf32>
    %166 = vector.shape_cast %165 : vector<2x1x512xf32> to vector<2x512xf32>
    %cst_48 = arith.constant dense<0.000000e+00> : vector<2x512xf32>
    %167 = tpu.matmul %164, %12, %cst_48 {dimension_numbers = #tpu.dot_dimension_numbers<[1], [0], [0], [1], [0, 0, 1, 1], [], []>} : vector<2x128xbf16>, vector<128x512xbf16>, vector<2x512xf32> -> vector<2x512xf32>
    %168 = arith.addf %166, %167 : vector<2x512xf32>
    %169 = vector.extract_strided_slice %168 {offsets = [0, 0], sizes = [2, 256], strides = [1, 1]} : vector<2x512xf32> to vector<2x256xf32>
    %cst_49 = arith.constant 5.000000e-01 : f32
    %170 = vector.broadcast %cst_49 : f32 to vector<2x256xf32>
    %171 = arith.mulf %170, %169 : vector<2x256xf32>
    %172 = math.tanh %171 : vector<2x256xf32>
    %cst_50 = arith.constant 1.000000e+00 : f32
    %173 = vector.broadcast %cst_50 : f32 to vector<2x256xf32>
    %174 = arith.addf %173, %172 : vector<2x256xf32>
    %cst_51 = arith.constant 5.000000e-01 : f32
    %175 = vector.broadcast %cst_51 : f32 to vector<2x256xf32>
    %176 = arith.mulf %175, %174 : vector<2x256xf32>
    %177 = vector.extract_strided_slice %176 {offsets = [0, 0], sizes = [2, 128], strides = [1, 1]} : vector<2x256xf32> to vector<2x128xf32>
    %178 = vector.extract_strided_slice %176 {offsets = [0, 128], sizes = [2, 128], strides = [1, 1]} : vector<2x256xf32> to vector<2x128xf32>
    %179 = vector.extract_strided_slice %168 {offsets = [0, 256], sizes = [2, 128], strides = [1, 1]} : vector<2x512xf32> to vector<2x128xf32>
    %180 = math.tanh %179 : vector<2x128xf32>
    %181 = vector.extract_strided_slice %168 {offsets = [0, 384], sizes = [2, 128], strides = [1, 1]} : vector<2x512xf32> to vector<2x128xf32>
    %cst_52 = arith.constant 5.000000e-01 : f32
    %182 = vector.broadcast %cst_52 : f32 to vector<2x128xf32>
    %183 = arith.mulf %182, %181 : vector<2x128xf32>
    %184 = math.tanh %183 : vector<2x128xf32>
    %cst_53 = arith.constant 1.000000e+00 : f32
    %185 = vector.broadcast %cst_53 : f32 to vector<2x128xf32>
    %186 = arith.addf %185, %184 : vector<2x128xf32>
    %cst_54 = arith.constant 5.000000e-01 : f32
    %187 = vector.broadcast %cst_54 : f32 to vector<2x128xf32>
    %188 = arith.mulf %187, %186 : vector<2x128xf32>
    %189 = arith.mulf %178, %161 : vector<2x128xf32>
    %190 = arith.mulf %177, %180 : vector<2x128xf32>
    %191 = arith.addf %189, %190 : vector<2x128xf32>
    %192 = math.tanh %191 : vector<2x128xf32>
    %193 = arith.mulf %188, %192 : vector<2x128xf32>
    %194 = arith.truncf %193 : vector<2x128xf32> to vector<2x128xbf16>
    %195 = vector.extract_strided_slice %11 {offsets = [0, 6, 0], sizes = [2, 1, 512], strides = [1, 1, 1]} : vector<2x8x512xf32> to vector<2x1x512xf32>
    %196 = vector.shape_cast %195 : vector<2x1x512xf32> to vector<2x512xf32>
    %cst_55 = arith.constant dense<0.000000e+00> : vector<2x512xf32>
    %197 = tpu.matmul %194, %12, %cst_55 {dimension_numbers = #tpu.dot_dimension_numbers<[1], [0], [0], [1], [0, 0, 1, 1], [], []>} : vector<2x128xbf16>, vector<128x512xbf16>, vector<2x512xf32> -> vector<2x512xf32>
    %198 = arith.addf %196, %197 : vector<2x512xf32>
    %199 = vector.extract_strided_slice %198 {offsets = [0, 0], sizes = [2, 256], strides = [1, 1]} : vector<2x512xf32> to vector<2x256xf32>
    %cst_56 = arith.constant 5.000000e-01 : f32
    %200 = vector.broadcast %cst_56 : f32 to vector<2x256xf32>
    %201 = arith.mulf %200, %199 : vector<2x256xf32>
    %202 = math.tanh %201 : vector<2x256xf32>
    %cst_57 = arith.constant 1.000000e+00 : f32
    %203 = vector.broadcast %cst_57 : f32 to vector<2x256xf32>
    %204 = arith.addf %203, %202 : vector<2x256xf32>
    %cst_58 = arith.constant 5.000000e-01 : f32
    %205 = vector.broadcast %cst_58 : f32 to vector<2x256xf32>
    %206 = arith.mulf %205, %204 : vector<2x256xf32>
    %207 = vector.extract_strided_slice %206 {offsets = [0, 0], sizes = [2, 128], strides = [1, 1]} : vector<2x256xf32> to vector<2x128xf32>
    %208 = vector.extract_strided_slice %206 {offsets = [0, 128], sizes = [2, 128], strides = [1, 1]} : vector<2x256xf32> to vector<2x128xf32>
    %209 = vector.extract_strided_slice %198 {offsets = [0, 256], sizes = [2, 128], strides = [1, 1]} : vector<2x512xf32> to vector<2x128xf32>
    %210 = math.tanh %209 : vector<2x128xf32>
    %211 = vector.extract_strided_slice %198 {offsets = [0, 384], sizes = [2, 128], strides = [1, 1]} : vector<2x512xf32> to vector<2x128xf32>
    %cst_59 = arith.constant 5.000000e-01 : f32
    %212 = vector.broadcast %cst_59 : f32 to vector<2x128xf32>
    %213 = arith.mulf %212, %211 : vector<2x128xf32>
    %214 = math.tanh %213 : vector<2x128xf32>
    %cst_60 = arith.constant 1.000000e+00 : f32
    %215 = vector.broadcast %cst_60 : f32 to vector<2x128xf32>
    %216 = arith.addf %215, %214 : vector<2x128xf32>
    %cst_61 = arith.constant 5.000000e-01 : f32
    %217 = vector.broadcast %cst_61 : f32 to vector<2x128xf32>
    %218 = arith.mulf %217, %216 : vector<2x128xf32>
    %219 = arith.mulf %208, %191 : vector<2x128xf32>
    %220 = arith.mulf %207, %210 : vector<2x128xf32>
    %221 = arith.addf %219, %220 : vector<2x128xf32>
    %222 = math.tanh %221 : vector<2x128xf32>
    %223 = arith.mulf %218, %222 : vector<2x128xf32>
    %224 = arith.truncf %223 : vector<2x128xf32> to vector<2x128xbf16>
    %225 = vector.extract_strided_slice %11 {offsets = [0, 7, 0], sizes = [2, 1, 512], strides = [1, 1, 1]} : vector<2x8x512xf32> to vector<2x1x512xf32>
    %226 = vector.shape_cast %225 : vector<2x1x512xf32> to vector<2x512xf32>
    %cst_62 = arith.constant dense<0.000000e+00> : vector<2x512xf32>
    %227 = tpu.matmul %224, %12, %cst_62 {dimension_numbers = #tpu.dot_dimension_numbers<[1], [0], [0], [1], [0, 0, 1, 1], [], []>} : vector<2x128xbf16>, vector<128x512xbf16>, vector<2x512xf32> -> vector<2x512xf32>
    %228 = arith.addf %226, %227 : vector<2x512xf32>
    %229 = vector.extract_strided_slice %228 {offsets = [0, 0], sizes = [2, 256], strides = [1, 1]} : vector<2x512xf32> to vector<2x256xf32>
    %cst_63 = arith.constant 5.000000e-01 : f32
    %230 = vector.broadcast %cst_63 : f32 to vector<2x256xf32>
    %231 = arith.mulf %230, %229 : vector<2x256xf32>
    %232 = math.tanh %231 : vector<2x256xf32>
    %cst_64 = arith.constant 1.000000e+00 : f32
    %233 = vector.broadcast %cst_64 : f32 to vector<2x256xf32>
    %234 = arith.addf %233, %232 : vector<2x256xf32>
    %cst_65 = arith.constant 5.000000e-01 : f32
    %235 = vector.broadcast %cst_65 : f32 to vector<2x256xf32>
    %236 = arith.mulf %235, %234 : vector<2x256xf32>
    %237 = vector.extract_strided_slice %236 {offsets = [0, 0], sizes = [2, 128], strides = [1, 1]} : vector<2x256xf32> to vector<2x128xf32>
    %238 = vector.extract_strided_slice %236 {offsets = [0, 128], sizes = [2, 128], strides = [1, 1]} : vector<2x256xf32> to vector<2x128xf32>
    %239 = vector.extract_strided_slice %228 {offsets = [0, 256], sizes = [2, 128], strides = [1, 1]} : vector<2x512xf32> to vector<2x128xf32>
    %240 = math.tanh %239 : vector<2x128xf32>
    %241 = vector.extract_strided_slice %228 {offsets = [0, 384], sizes = [2, 128], strides = [1, 1]} : vector<2x512xf32> to vector<2x128xf32>
    %cst_66 = arith.constant 5.000000e-01 : f32
    %242 = vector.broadcast %cst_66 : f32 to vector<2x128xf32>
    %243 = arith.mulf %242, %241 : vector<2x128xf32>
    %244 = math.tanh %243 : vector<2x128xf32>
    %cst_67 = arith.constant 1.000000e+00 : f32
    %245 = vector.broadcast %cst_67 : f32 to vector<2x128xf32>
    %246 = arith.addf %245, %244 : vector<2x128xf32>
    %cst_68 = arith.constant 5.000000e-01 : f32
    %247 = vector.broadcast %cst_68 : f32 to vector<2x128xf32>
    %248 = arith.mulf %247, %246 : vector<2x128xf32>
    %249 = arith.mulf %238, %221 : vector<2x128xf32>
    %250 = arith.mulf %237, %240 : vector<2x128xf32>
    %251 = arith.addf %249, %250 : vector<2x128xf32>
    %252 = math.tanh %251 : vector<2x128xf32>
    %253 = arith.mulf %248, %252 : vector<2x128xf32>
    %254 = arith.truncf %253 : vector<2x128xf32> to vector<2x128xbf16>
    %c0_69 = arith.constant 0 : index
    %c0_70 = arith.constant 0 : index
    %255 = vector.load %arg8[%c0_69, %c0_70] : memref<2x128xbf16, #tpu.memory_space<vmem>>, vector<2x128xbf16>
    tpu.vector_store %arg8[%c0_69, %c0_70], %254 {strides = array<i32>} : memref<2x128xbf16, #tpu.memory_space<vmem>>, vector<2x128xbf16>,
    %c0_71 = arith.constant 0 : index
    %c0_72 = arith.constant 0 : index
    %256 = vector.load %arg9[%c0_71, %c0_72] : memref<2x128xf32, #tpu.memory_space<vmem>>, vector<2x128xf32>
    tpu.vector_store %arg9[%c0_71, %c0_72], %251 {strides = array<i32>} : memref<2x128xf32, #tpu.memory_space<vmem>>, vector<2x128xf32>,
    %c0_i32_73 = arith.constant 0 : i32
    %257 = arith.cmpi eq, %arg0, %c0_i32_73 : i32
    %258 = arith.extui %257 : i1 to i32
    %c0_i32_74 = arith.constant 0 : i32
    %259 = arith.cmpi ne, %258, %c0_i32_74 : i32
    scf.if %259 {
      %c0_75 = arith.constant 0 : index
      %c0_76 = arith.constant 0 : index
      %260 = vector.load %arg5[%c0_75, %c0_76] : memref<128x128xbf16, #tpu.memory_space<vmem>>, vector<128x128xbf16>
      %cst_77 = arith.constant dense<0.000000e+00> : vector<2x128xf32>
      %261 = tpu.matmul %254, %260, %cst_77 {dimension_numbers = #tpu.dot_dimension_numbers<[1], [0], [0], [1], [0, 0, 1, 1], [], []>} : vector<2x128xbf16>, vector<128x128xbf16>, vector<2x128xf32> -> vector<2x128xf32>
      %c0_78 = arith.constant 0 : index
      %c0_79 = arith.constant 0 : index
      %262 = vector.load %arg6[%c0_78, %c0_79] : memref<1x128xf32, #tpu.memory_space<vmem>>, vector<1x128xf32>
      %263 = vector.broadcast %262 : vector<1x128xf32> to vector<2x128xf32>
      %264 = arith.addf %261, %263 : vector<2x128xf32>
      %c0_80 = arith.constant 0 : index
      %c0_81 = arith.constant 0 : index
      %265 = vector.load %arg7[%c0_80, %c0_81] : memref<2x128xf32, #tpu.memory_space<vmem>>, vector<2x128xf32>
      tpu.vector_store %arg7[%c0_80, %c0_81], %264 {strides = array<i32>} : memref<2x128xf32, #tpu.memory_space<vmem>>, vector<2x128xf32>,
    } else {
    }
    return
  }
  func.func @transform_0(%arg0: i32) -> (i32, i32, i32) {
    %c0_i32 = arith.constant 0 : i32
    %c0_i32_0 = arith.constant 0 : i32
    %c0_i32_1 = arith.constant 0 : i32
    return %c0_i32, %arg0, %c0_i32_0 : i32, i32, i32
  }
  func.func @transform_1(%arg0: i32) -> (i32, i32) {
    %c0_i32 = arith.constant 0 : i32
    %c0_i32_0 = arith.constant 0 : i32
    %c0_i32_1 = arith.constant 0 : i32
    return %c0_i32, %c0_i32_0 : i32, i32
  }
  func.func @transform_2(%arg0: i32) -> (i32, i32) {
    %c0_i32 = arith.constant 0 : i32
    %c0_i32_0 = arith.constant 0 : i32
    %c0_i32_1 = arith.constant 0 : i32
    return %c0_i32, %c0_i32_0 : i32, i32
  }
  func.func @transform_3(%arg0: i32) -> (i32, i32) {
    %c0_i32 = arith.constant 0 : i32
    %c0_i32_0 = arith.constant 0 : i32
    %c0_i32_1 = arith.constant 0 : i32
    return %c0_i32, %c0_i32_0 : i32, i32
  }
  func.func @transform_4(%arg0: i32) -> (i32, i32) {
    %c0_i32 = arith.constant 0 : i32
    %c0_i32_0 = arith.constant 0 : i32
    %c0_i32_1 = arith.constant 0 : i32
    return %c0_i32, %c0_i32_0 : i32, i32
  }
  func.func @transform_5(%arg0: i32) -> (i32, i32) {
    %c0_i32 = arith.constant 0 : i32
    %c0_i32_0 = arith.constant 0 : i32
    %c0_i32_1 = arith.constant 0 : i32
    return %c0_i32, %c0_i32_0 : i32, i32
  }
  func.func @transform_6(%arg0: i32) -> (i32, i32) {
    %c0_i32 = arith.constant 0 : i32
    %c0_i32_0 = arith.constant 0 : i32
    %c0_i32_1 = arith.constant 0 : i32
    return %c0_i32, %c0_i32_0 : i32, i32
  }
}

</mosaic_0001>

<bundles_post_ra>
// kernel: tpu_custom_call.1
= control target key start
LH: loop header
LB: loop body
LE: loop exit
PB: predicated region body
PF: predicated region fallthrough
CT: control target
= control target key end

     0   :  { %11 = vsyncpa [#allocation5], 0  ;;  %s3195_s0 = inlined_call_operand.hbm [shape: f32[2,8,75], index: 0, kind: input, shape index: {}]   ;;  %s3196_s1 = inlined_call_operand.hbm [shape: bf16[75,512], index: 1, kind: input, shape index: {}]   ;;  %s3197_s2 = inlined_call_operand.hbm [shape: bf16[128,512], index: 2, kind: input, shape index: {}]   ;;  %s3198_s3 = inlined_call_operand.vmem [shape: f32[1,512], index: 3, kind: input, shape index: {}]   ;;  %s3199_s4 = inlined_call_operand.hbm [shape: bf16[128,128], index: 4, kind: input, shape index: {}]   ;;  %s3200_s5 = inlined_call_operand.vmem [shape: f32[1,128], index: 5, kind: input, shape index: {}]   ;;  %s3201_s6 = inlined_call_operand.hbm [shape: f32[2,128], index: 6, kind: output, shape index: {}]  }
   0x1   :  { %12 = vsyncpa [#allocation8], 0 }
   0x2   :  { %13 = vsyncpa [#allocation11], 0 }
   0x3   :  { %14 = vsyncpa [#allocation6], 0  ;;  %s2544_s21 = smov [#allocation7]  }
   0x4   :  { %s32_s22 = sshll.u32 %s2544_s21, 4  ;;  %s33_s22 = int_to_ptr.vmem [resolvable:$true] %s32_s22 }
   0x5   :  { %s2444_s23 = scalar_lea.vmem %s33_s22, 2560  ;;  %p2449_p1 = scmp.lt.s32.totalorder %s33_s22, %s33_s22 }
   0x6   :  { %p2445_p0 = scmp.ne.s32.totalorder %s33_s22, %s2444_s23  ;;  %p2450_p2 = scmp.lt.s32.totalorder %s2444_s23, %s2444_s23 }
   0x8   :  { %p2451_p3 = por %p2450_p2, %p2449_p1 }
   0xa   :  { %p2452_p4 = pnand %p2451_p3, %p2445_p0 }
   0xc   :  { %2455 = shalt.err (!%p2452_p4)
}
   0xd   :  { %s2545_s24 = smov 256   ;;  %s2546_s25 = smov 16  }
   0xe   :  { %38 = dma.hbm_to_vmem [thread:$0]  %s3196_s1, 2560, %s33_s22, [#allocation8], %s2545_s24, %s2545_s24, %s2546_s25  }
   0xf   :  { %s2547_s28 = smov [#allocation4]  }
  0x10   :  { %s20_s29 = sshll.u32 %s2547_s28, 4  ;;  %s21_s29 = int_to_ptr.vmem [resolvable:$true] %s20_s29 }
  0x11   :  { %s2464_s30 = scalar_lea.vmem %s21_s29, 256  ;;  %p2469_p6 = scmp.lt.s32.totalorder %s21_s29, %s21_s29 }
  0x12   :  { %p2465_p5 = scmp.ne.s32.totalorder %s21_s29, %s2464_s30  ;;  %p2470_p7 = scmp.lt.s32.totalorder %s2464_s30, %s2464_s30 }
  0x14   :  { %p2471_p8 = por %p2470_p7, %p2469_p6 }
  0x16   :  { %p2472_p9 = pnand %p2471_p8, %p2465_p5 }
  0x18   :  { %2475 = shalt.err (!%p2472_p9)
}
  0x19   :  { %s2548_s7 = smov 128   ;;  %s2549_s8 = smov 8  }
  0x1a   :  { %26 = dma.hbm_to_vmem [thread:$0]  %s3195_s0, 256, %s21_s29, [#allocation5], %s2548_s7, %s2548_s7, %s2549_s8  }
  0x1b   :  { %s2550_s11 = smov [#allocation9]   ;;  %s2551_s13 = smov [#allocation10]  }
  0x1c   :  { %s44_s12 = sshll.u32 %s2550_s11, 4  ;;  %s58_s1 = sshll.u32 %s2551_s13, 4  ;;  %s45_s12 = int_to_ptr.vmem [resolvable:$true] %s44_s12  ;;  %s59_s1 = int_to_ptr.vmem [resolvable:$true] %s58_s1 }
  0x1d   :  { %s2484_s14 = scalar_lea.vmem %s45_s12, 4096  ;;  %p2489_p11 = scmp.lt.s32.totalorder %s45_s12, %s45_s12 }
  0x1e   :  { %p2485_p10 = scmp.ne.s32.totalorder %s45_s12, %s2484_s14  ;;  %p2490_p12 = scmp.lt.s32.totalorder %s2484_s14, %s2484_s14 }
  0x20   :  { %p2491_p13 = por %p2490_p12, %p2489_p11 }
  0x22   :  { %p2492_p0 = pnand %p2491_p13, %p2485_p10 }
  0x24   :  { %2495 = shalt.err (!%p2492_p0)
}
  0x25   :  { %50 = dma.hbm_to_vmem [thread:$0]  %s3197_s2, 4096, %s45_s12, [#allocation8], %s2545_s24, %s2545_s24, %s2546_s25  }
  0x26   :  { %s2504_s0 = scalar_lea.vmem %s59_s1, 1024  ;;  %p2509_p2 = scmp.lt.s32.totalorder %s59_s1, %s59_s1 }
  0x27   :  { %p2505_p1 = scmp.ne.s32.totalorder %s59_s1, %s2504_s0  ;;  %p2510_p3 = scmp.lt.s32.totalorder %s2504_s0, %s2504_s0 }
  0x29   :  { %p2511_p4 = por %p2510_p3, %p2509_p2 }
  0x2b   :  { %p2512_p5 = pnand %p2511_p4, %p2505_p1 }
  0x2d   :  { %2515 = shalt.err (!%p2512_p5)
}
  0x2e   :  { %s2552_s17 = smov 64   ;;  %s2553_s18 = smov 4  }
  0x2f   :  { %64 = dma.hbm_to_vmem [thread:$0]  %s3199_s4, 1024, %s59_s1, [#allocation11], %s2552_s17, %s2552_s17, %s2553_s18  }
  0x30   :  { %2536 = dma.done.wait [#allocation5], 256  }
  0x31   :  { %2537 = vsyncadd [#allocation5], 4294967040 }
  0x32   :  { %2538 = dma.done.wait [#allocation8], 6656  }
  0x33   :  { %2539 = vsyncadd [#allocation8], 4294960640 }
  0x34   :  { %2540 = dma.done.wait [#allocation11], 1024  }
  0x35   :  { %2541 = vsyncadd [#allocation11], 4294966272  ;;  %v3204_v0 = vmov 0   ;;  %vm237_vm0 = vcmask 1044480   ;;  %vm238_vm1 = vcmask 1045504   ;;  %v2555_v1 = vmov 65535  }
  0x36   :  { %285 = vmatprep.mubr.bf16.mxu1 %v3204_v0  ;;  %84 = vst [vmem:[#allocation2] sm:$0x1] %v3204_v0  ;;  %565 = vmatprep.mubr.bf16.mxu0 %v3204_v0  ;;  %v239_v2 = vsel %vm237_vm0, 4294967295, %v2555_v1  ;;  %v2617_v3 = vld [vmem:[#allocation9 + $0xe4] ss:$16 sps:$4 sm:$0xff]   ;;  %v87_v30 = vld [vmem:[#allocation4 + $0x8] sm:$0xff] }
  0x37   :  { %v2619_v4 = vld [vmem:[#allocation9 + $0xe0] ss:$16 sps:$4 sm:$0xff]   ;;  %v240_v5 = vsel %vm238_vm1, %v239_v2, 0  ;;  %533 = vmatprep.subr.bf16.mxu0 %v2617_v3  ;;  %v2161_v6 = vld [vmem:[#allocation7 + $0x84] ss:$16 sps:$4 sm:$0x3f]  }
  0x38   :  { %v2163_v7 = vld [vmem:[#allocation7 + $0x80] ss:$16 sps:$4 sm:$0x3f]   ;;  %534 = vmatpush1.bf16.msra.mxu0 %v2619_v4  ;;  %v2623_v8 = vld [vmem:[#allocation9 + $0xc4] ss:$16 sps:$4 sm:$0xff]   ;;  %v245_v9 = vand.u32 %v2161_v6, %v240_v5  ;;  %vm233_vm2 = vcmask 613376  }
  0x39   :  { %v242_v10 = vand.u32 %v2163_v7, %v240_v5  ;;  %v2625_v11 = vld [vmem:[#allocation9 + $0xc0] ss:$16 sps:$4 sm:$0xff]   ;;  %535 = vmatprep.subr.bf16.mxu0 %v2623_v8  ;;  %v2167_v12 = vld [vmem:[#allocation7 + $0x64] ss:$16 sps:$4 sm:$0xff]   ;;  %v2199_v37 = vld [vmem:[#allocation7 + $0x6c] ss:$16 sps:$4 sm:$0xff]  }
  0x3a   :  { %259 = vmatprep.subr.bf16.mxu1 %v245_v9  ;;  %v2169_v13 = vld [vmem:[#allocation7 + $0x60] ss:$16 sps:$4 sm:$0xff]   ;;  %v2628_v14 = vld [vmem:[#allocation9 + $0xa4] ss:$16 sps:$4 sm:$0xff]   ;;  %v2197_v39 = vld [vmem:[#allocation7 + $0x68] ss:$16 sps:$4 sm:$0xff]   ;;  %v112_v9 = vlaneseq }
  0x3b   :  { %260 = vmatpush1.bf16.msra.mxu1 %v242_v10  ;;  %v2631_v15 = vld [vmem:[#allocation9 + $0xa0] ss:$16 sps:$4 sm:$0xff]   ;;  %v2173_v16 = vld [vmem:[#allocation7 + $0x44] ss:$16 sps:$4 sm:$0xff]   ;;  %v2205_v41 = vld [vmem:[#allocation7 + $0x4c] ss:$16 sps:$4 sm:$0xff]  }
  0x3c   :  { %536 = vmatpush1.bf16.msra.mxu0 %v2625_v11  ;;  %261 = vmatprep.subr.bf16.mxu1 %v2167_v12  ;;  %v2634_v17 = vld [vmem:[#allocation9 + $0x84] ss:$16 sps:$4 sm:$0xff]   ;;  %v2175_v18 = vld [vmem:[#allocation7 + $0x40] ss:$16 sps:$4 sm:$0xff]   ;;  %v2203_v42 = vld [vmem:[#allocation7 + $0x48] ss:$16 sps:$4 sm:$0xff]  }
  0x3d   :  { %537 = vmatprep.subr.bf16.mxu0 %v2628_v14  ;;  %v2636_v19 = vld [vmem:[#allocation9 + $0x80] ss:$16 sps:$4 sm:$0xff]   ;;  %v2179_v20 = vld [vmem:[#allocation7 + $0x24] ss:$16 sps:$4 sm:$0xff]   ;;  %v2667_v43 = vld [vmem:[#allocation2] sm:$0x1] }
  0x3e   :  { %v2640_v21 = vld [vmem:[#allocation9 + $0x64] ss:$16 sps:$4 sm:$0xff]   ;;  %v2181_v22 = vld [vmem:[#allocation7 + $0x20] ss:$16 sps:$4 sm:$0xff]   ;;  %v2208_v44 = vld [vmem:[#allocation7 + $0x2c] ss:$16 sps:$4 sm:$0xff]  }
  0x3f   :  { %262 = vmatpush1.bf16.msra.mxu1 %v2169_v13  ;;  %v2643_v23 = vld [vmem:[#allocation9 + $0x60] ss:$16 sps:$4 sm:$0xff]   ;;  %v2185_v24 = vld [vmem:[#allocation7 + $0x4] ss:$16 sps:$4 sm:$0xff]   ;;  %v2206_v45 = vld [vmem:[#allocation7 + $0x28] ss:$16 sps:$4 sm:$0xff]  }
  0x40   :  { %538 = vmatpush1.bf16.msra.mxu0 %v2631_v15  ;;  %263 = vmatprep.subr.bf16.mxu1 %v2173_v16  ;;  %v2646_v25 = vld [vmem:[#allocation9 + $0x44] ss:$16 sps:$4 sm:$0xff]   ;;  %v2187_v26 = vld [vmem:[#allocation7] ss:$16 sps:$4 sm:$0xff]   ;;  %v2211_v46 = vld [vmem:[#allocation7 + $0xc] ss:$16 sps:$4 sm:$0xff]  }
  0x41   :  { %539 = vmatprep.subr.bf16.mxu0 %v2634_v17  ;;  %v2648_v27 = vld [vmem:[#allocation9 + $0x40] ss:$16 sps:$4 sm:$0xff]   ;;  %v2193_v28 = vld [vmem:[#allocation7 + $0x8c] ss:$16 sps:$4 sm:$0x3f]   ;;  %v3202_v1 = vmov 0.0  }
  0x42   :  { %v86_v29 = vld [vmem:[#allocation4] sm:$0xff]  ;;  %v2191_v31 = vld [vmem:[#allocation7 + $0x88] ss:$16 sps:$4 sm:$0x3f]   ;;  %v251_v32 = vand.u32 %v2193_v28, %v240_v5  ;;  %v2674_v48 = vld [vmem:[#allocation9 + $0xec] ss:$16 sps:$4 sm:$0xff]  }
  0x43   :  { %264 = vmatpush1.bf16.msra.mxu1 %v2175_v18  ;;  %v2652_v33 = vld [vmem:[#allocation9 + $0x24] ss:$16 sps:$4 sm:$0xff]   ;;  %v2111_v34 = vpack.c.bf16 %v87_v30, %v86_v29  ;;  %v248_v35 = vand.u32 %v2191_v31, %v240_v5  ;;  %v2655_v36 = vld [vmem:[#allocation9 + $0x20] ss:$16 sps:$4 sm:$0xff]   ;;  %v2209_v47 = vld [vmem:[#allocation7 + $0x8] ss:$16 sps:$4 sm:$0xff]  }
  0x44   :  { %540 = vmatpush1.bf16.msra.mxu0 %v2636_v19  ;;  %265 = vmatprep.subr.bf16.mxu1 %v2179_v20  ;;  %v2658_v38 = vld [vmem:[#allocation9 + $0x4] ss:$16 sps:$4 sm:$0xff]   ;;  %v2662_v40 = vld [vmem:[#allocation9] ss:$16 sps:$4 sm:$0xff]   ;;  %v2678_v49 = vld [vmem:[#allocation9 + $0xe8] ss:$16 sps:$4 sm:$0xff]  }
  0x45   :  { %541 = vmatprep.subr.bf16.mxu0 %v2640_v21  ;;  %v2682_v50 = vld [vmem:[#allocation9 + $0xcc] ss:$16 sps:$4 sm:$0xff]   ;;  %v2687_v51 = vld [vmem:[#allocation9 + $0xc8] ss:$16 sps:$4 sm:$0xff]   ;;  %85 = vst [vmem:[#allocation3] sm:$0x3] %v3202_v1 }
  0x46   :  { %v2691_v52 = vld [vmem:[#allocation9 + $0xac] ss:$16 sps:$4 sm:$0xff]   ;;  %v2696_v53 = vld [vmem:[#allocation9 + $0xa8] ss:$16 sps:$4 sm:$0xff]   ;;  %v2758_v12 = vshrl.u32 %v112_v9, 7  ;;  %vm686_vm3 = vcmask 1041409  }
  0x47   :  { %266 = vmatpush1.bf16.msra.mxu1 %v2181_v22  ;;  %v2699_v54 = vld [vmem:[#allocation9 + $0x8c] ss:$16 sps:$4 sm:$0xff]   ;;  %v2704_v55 = vld [vmem:[#allocation9 + $0x88] ss:$16 sps:$4 sm:$0xff]   ;;  %vm2557_vm4 = vmmov 0   ;;  %s2560_s22 = smov [#allocation12]  }
  0x48   :  { %542 = vmatpush1.bf16.msra.mxu0 %v2643_v23  ;;  %267 = vmatprep.subr.bf16.mxu1 %v2185_v24  ;;  %v2707_v56 = vld [vmem:[#allocation9 + $0x6c] ss:$16 sps:$4 sm:$0xff]   ;;  %v2712_v57 = vld [vmem:[#allocation9 + $0x68] ss:$16 sps:$4 sm:$0xff]   ;;  %3208 = vst [vmem:[#allocation17_spill] sm:$0xff] %v2758_v12  ;;  %v118_v16 = vsub.s32 1, %v2758_v12 }
  0x49   :  { %543 = vmatprep.subr.bf16.mxu0 %v2646_v25  ;;  %v2715_v58 = vld [vmem:[#allocation9 + $0x4c] ss:$16 sps:$4 sm:$0xff]   ;;  %v2720_v59 = vld [vmem:[#allocation9 + $0x48] ss:$16 sps:$4 sm:$0xff]   ;;  %v114_v20 = vsub.s32 0, %v2758_v12  ;;  %s2035_s23 = sshll.u32 %s2560_s22, 4  ;;  %s2036_s23 = int_to_ptr.vmem [resolvable:$true] %s2035_s23 }
  0x4a   :  { %v2723_v60 = vld [vmem:[#allocation9 + $0x2c] ss:$16 sps:$4 sm:$0xff]   ;;  %v2728_v61 = vld [vmem:[#allocation9 + $0x28] ss:$16 sps:$4 sm:$0xff]   ;;  %s2516_s24 = scalar_lea.vmem %s2036_s23, 32  ;;  %p2521_p7 = scmp.lt.s32.totalorder %s2036_s23, %s2036_s23 }
  0x4b   :  { %268 = vmatpush1.bf16.msra.mxu1 %v2187_v26  ;;  %v2731_v62 = vld [vmem:[#allocation9 + $0xc] ss:$16 sps:$4 sm:$0xff]   ;;  %v2734_v63 = vld [vmem:[#allocation9 + $0x8] ss:$16 sps:$4 sm:$0xff]   ;;  %p2517_p6 = scmp.ne.s32.totalorder %s2036_s23, %s2516_s24  ;;  %p2522_p8 = scmp.lt.s32.totalorder %s2516_s24, %s2516_s24 }
  0x4c   :  { %544 = vmatpush1.bf16.msra.mxu0 %v2648_v27  ;;  %302 = vmatprep.subr.bf16.mxu1 %v251_v32  ;;  %v110_v18 = vld [vmem:[%s3198_s3] sm:$0xf] }
  0x4d   :  { %545 = vmatprep.subr.bf16.mxu0 %v2652_v33  ;;  %v119_v24 = vrot.slane %v110_v18, %v118_v16  ;;  %v115_v26 = vrot.slane %v110_v18, %v114_v20  ;;  %p2523_p9 = por %p2522_p8, %p2521_p7 }
  0x4e   :  { %2067 = vmatmul.mubr.msk.bf16.vlgmr.msra.gmra.mxu1 %vm233_vm2, %v2111_v34 }
  0x4f   :  { %303 = vmatpush1.bf16.msra.mxu1 %v248_v35  ;;  %328 = vmatprep.mubr.bf16.mxu1 %v3204_v0  ;;  %p2524_p10 = pnand %p2523_p9, %p2517_p6 }
  0x50   :  { %546 = vmatpush1.bf16.msra.mxu0 %v2655_v36  ;;  %304 = vmatprep.subr.bf16.mxu1 %v2199_v37 }
  0x51   :  { %547 = vmatprep.subr.bf16.mxu0 %v2658_v38 }
  0x53   :  { %305 = vmatpush1.bf16.msra.mxu1 %v2197_v39 }
  0x54   :  { %548 = vmatpush1.bf16.msra.mxu0 %v2662_v40  ;;  %306 = vmatprep.subr.bf16.mxu1 %v2205_v41 }
  0x55   :  { %690 = vmatprep.subr.bf16.mxu0 %v2617_v3 }
  0x57   :  { %566 = vmatmul.mubr.bf16.vlgmr.msra.gmra.mxu0 %v2667_v43  ;;  %307 = vmatpush1.bf16.msra.mxu1 %v2203_v42 }
  0x58   :  { %691 = vmatpush1.bf16.msra.mxu0 %v2619_v4  ;;  %308 = vmatprep.subr.bf16.mxu1 %v2208_v44 }
  0x59   :  { %692 = vmatprep.subr.bf16.mxu0 %v2623_v8  ;;  %722 = vmatprep.mubr.bf16.mxu0 %v3204_v0 }
  0x5b   :  { %309 = vmatpush1.bf16.msra.mxu1 %v2206_v45 }
  0x5c   :  { %693 = vmatpush1.bf16.msra.mxu0 %v2625_v11  ;;  %310 = vmatprep.subr.bf16.mxu1 %v2211_v46 }
  0x5d   :  { %694 = vmatprep.subr.bf16.mxu0 %v2628_v14 }
  0x5f   :  { %311 = vmatpush1.bf16.msra.mxu1 %v2209_v47 }
  0x60   :  { %695 = vmatpush1.bf16.msra.mxu0 %v2631_v15  ;;  %574 = vmatprep.subr.bf16.mxu1 %v2674_v48 }
  0x61   :  { %696 = vmatprep.subr.bf16.mxu0 %v2634_v17 }
  0x62   :  { %2068 = vmatmul.mubr.msk.bf16.vlgmr.msra.gmra.mxu1 %vm233_vm2, %v2111_v34 }
  0x63   :  { %575 = vmatpush1.bf16.msra.mxu1 %v2678_v49  ;;  %606 = vmatprep.mubr.bf16.mxu1 %v3204_v0 }
  0x64   :  { %576 = vmatprep.subr.bf16.mxu1 %v2682_v50  ;;  %697 = vmatpush1.bf16.msra.mxu0 %v2636_v19 }
  0x65   :  { %698 = vmatprep.subr.bf16.mxu0 %v2640_v21 }
  0x67   :  { %577 = vmatpush1.bf16.msra.mxu1 %v2687_v51 }
  0x68   :  { %578 = vmatprep.subr.bf16.mxu1 %v2691_v52  ;;  %699 = vmatpush1.bf16.msra.mxu0 %v2643_v23 }
  0x69   :  { %700 = vmatprep.subr.bf16.mxu0 %v2646_v25 }
  0x6b   :  { %579 = vmatpush1.bf16.msra.mxu1 %v2696_v53 }
  0x6c   :  { %580 = vmatprep.subr.bf16.mxu1 %v2699_v54  ;;  %701 = vmatpush1.bf16.msra.mxu0 %v2648_v27 }
  0x6d   :  { %702 = vmatprep.subr.bf16.mxu0 %v2652_v33 }
  0x6f   :  { %581 = vmatpush1.bf16.msra.mxu1 %v2704_v55 }
  0x70   :  { %582 = vmatprep.subr.bf16.mxu1 %v2707_v56  ;;  %703 = vmatpush1.bf16.msra.mxu0 %v2655_v36 }
  0x71   :  { %704 = vmatprep.subr.bf16.mxu0 %v2658_v38 }
  0x73   :  { %583 = vmatpush1.bf16.msra.mxu1 %v2712_v57 }
  0x74   :  { %584 = vmatprep.subr.bf16.mxu1 %v2715_v58  ;;  %705 = vmatpush1.bf16.msra.mxu0 %v2662_v40 }
  0x75   :  { %848 = vmatprep.subr.bf16.mxu0 %v2617_v3 }
  0x77   :  { %585 = vmatpush1.bf16.msra.mxu1 %v2720_v59 }
  0x78   :  { %586 = vmatprep.subr.bf16.mxu1 %v2723_v60 }
  0x7b   :  { %587 = vmatpush1.bf16.msra.mxu1 %v2728_v61 }
  0x7c   :  { %588 = vmatprep.subr.bf16.mxu1 %v2731_v62 }
  0x7f   :  { %589 = vmatpush1.bf16.msra.mxu1 %v2734_v63 }
  0x80   :  { %731 = vmatprep.subr.bf16.mxu1 %v2674_v48 }
  0x82   :  { %607 = vmatmul.mubr.bf16.vlgmr.msra.gmra.mxu1 %v2667_v43 }
  0x83   :  { %732 = vmatpush1.bf16.msra.mxu1 %v2678_v49  ;;  %763 = vmatprep.mubr.bf16.mxu1 %v3204_v0 }
  0x84   :  { %733 = vmatprep.subr.bf16.mxu1 %v2682_v50 }
  0x87   :  { %734 = vmatpush1.bf16.msra.mxu1 %v2687_v51 }
  0x88   :  { %735 = vmatprep.subr.bf16.mxu1 %v2691_v52 }
  0x8b   :  { %736 = vmatpush1.bf16.msra.mxu1 %v2696_v53 }
  0x8c   :  { %737 = vmatprep.subr.bf16.mxu1 %v2699_v54 }
  0x8f   :  { %738 = vmatpush1.bf16.msra.mxu1 %v2704_v55 }
  0x90   :  { %739 = vmatprep.subr.bf16.mxu1 %v2707_v56 }
  0x93   :  { %740 = vmatpush1.bf16.msra.mxu1 %v2712_v57 }
  0x94   :  { %741 = vmatprep.subr.bf16.mxu1 %v2715_v58 }
  0x97   :  { %742 = vmatpush1.bf16.msra.mxu1 %v2720_v59 }
  0x98   :  { %743 = vmatprep.subr.bf16.mxu1 %v2723_v60 }
  0x9b   :  { %744 = vmatpush1.bf16.msra.mxu1 %v2728_v61 }
  0x9c   :  { %745 = vmatprep.subr.bf16.mxu1 %v2731_v62 }
  0x9f   :  { %746 = vmatpush1.bf16.msra.mxu1 %v2734_v63 }
  0xa0   :  { %889 = vmatprep.subr.bf16.mxu1 %v2674_v48 }
 0x10e   :  { %v287_v10 = vpop.f32.mrf.mxu1 }
 0x10f   :  { %v2767_v31 = vadd.f32 %v287_v10, %v115_v26 }
 0x110   :  { %v289_v13 = vpop.f32.mrf.mxu1 }
 0x111   :  { %v2765_v29 = vadd.f32 %v289_v13, %v119_v24 }
 0x112   :  { %v291_v22 = vpop.f32.mrf.mxu1 }
 0x113   :  { %v2773_v41 = vadd.f32 %v291_v22, %v115_v26 }
 0x114   :  { %v293_v28 = vpop.f32.mrf.mxu1 }
 0x115   :  { %v2769_v32 = vadd.f32 %v293_v28, %v119_v24 }
 0x117   :  { %v567_v2 = vpop.f32.mrf.mxu0 }
 0x118   :  { %v619_v34 = vrot.slane %v567_v2, 1  ;;  %v631_v37 = vadd.f32 %v567_v2, %v2767_v31  ;;  %v126_v2 = vsub.s32 3, %v2758_v12 }
 0x119   :  { %v569_v5 = vpop.f32.mrf.mxu0 }
 0x11a   :  { %v620_v30 = vrot.slane %v569_v5, 1  ;;  %v632_v35 = vadd.f32 %v569_v5, %v2765_v29  ;;  %v635_v43 = vadd.f32 %v619_v34, %v2773_v41  ;;  %v639_v45 = vmul.f32 0.5, %v631_v37 }
 0x11b   :  { %v571_v6 = vpop.f32.mrf.mxu0  ;;  %v127_v16 = vrot.slane %v110_v18, %v126_v2 }
 0x11c   :  { %v636_v42 = vadd.f32 %v620_v30, %v2769_v32  ;;  %v640_v44 = vmul.f32 0.5, %v632_v35  ;;  %v122_v6 = vsub.s32 2, %v2758_v12 }
 0x11d   :  { %v572_v7 = vpop.f32.mrf.mxu0 }
 0x11e   :  { %v642_v47 = vmul.f32 0.5, %v636_v42  ;;  %v641_v7 = vmul.f32 0.5, %v635_v43  ;;  %2244 = vtanh.f32 %v640_v44  ;;  %v123_v5 = vrot.slane %v110_v18, %v122_v6 }
 0x11f   :  { %2246 = vtanh.f32 %v639_v45 }
 0x120   :  { %2248 = vtanh.f32 %v642_v47 }
 0x121   :  { %2250 = vtanh.f32 %v641_v7 }
 0x122   :  { %v330_v39 = vpop.f32.mrf.mxu1 }
 0x123   :  { %v2779_v13 = vadd.f32 %v330_v39, %v123_v5 }
 0x124   :  { %v332_v46 = vpop.f32.mrf.mxu1 }
 0x125   :  { %v2784_v30 = vadd.f32 %v332_v46, %v127_v16 }
 0x126   :  { %v334_v9 = vpop.f32.mrf.mxu1 }
 0x127   :  { %v2781_v22 = vadd.f32 %v334_v9, %v123_v5 }
 0x128   :  { %v336_v10 = vpop.f32.mrf.mxu1 }
 0x129   :  { %v2787_v42 = vadd.f32 %v336_v10, %v127_v16 }
 0x12b   :  { %v2245_v18 = vpop.eup %2244 }
 0x12c   :  { %v2247_v44 = vpop.eup %2246  ;;  %v648_v6 = vadd.f32 1.0, %v2245_v18 }
 0x12d   :  { %v2249_v47 = vpop.eup %2248  ;;  %v647_v9 = vadd.f32 1.0, %v2247_v44 }
 0x12e   :  { %v2251_v46 = vpop.eup %2250  ;;  %v650_v5 = vadd.f32 1.0, %v2249_v47 }
 0x12f   :  { %v651_v10 = vmul.f32 0.5, %v647_v9 }
 0x130   :  { %v654_v16 = vmul.f32 0.5, %v650_v5 }
 0x142   :  { %v608_v20 = vpop.f32.mrf.mxu1 }
 0x143   :  { %v621_v24 = vrot.slane %v608_v20, 1  ;;  %v633_v26 = vadd.f32 %v608_v20, %v2779_v13  ;;  %v372_v20 = vld [vmem:[#allocation3] sm:$0x3] }
 0x144   :  { %v610_v28 = vpop.f32.mrf.mxu1 }
 0x145   :  { %v637_v34 = vadd.f32 %v621_v24, %v2781_v22  ;;  %2252 = vtanh.f32 %v633_v26  ;;  %v622_v35 = vrot.slane %v610_v28, 1  ;;  %v634_v39 = vadd.f32 %v610_v28, %v2784_v30 }
 0x146   :  { %v612_v37 = vpop.f32.mrf.mxu1  ;;  %v649_v24 = vadd.f32 1.0, %v2251_v46  ;;  %v652_v26 = vmul.f32 0.5, %v648_v6 }
 0x147   :  { %2254 = vtanh.f32 %v637_v34  ;;  %v638_v45 = vadd.f32 %v622_v35, %v2787_v42  ;;  %v657_v7 = vmul.f32 0.5, %v634_v39  ;;  %v666_v34 = vrot.slane %v372_v20, 1 }
 0x148   :  { %v613_v43 = vpop.f32.mrf.mxu1  ;;  %v653_v37 = vmul.f32 0.5, %v649_v24 }
 0x149   :  { %v658_v2 = vmul.f32 0.5, %v638_v45  ;;  %2256 = vtanh.f32 %v657_v7  ;;  %v669_v43 = vmul.f32 %v652_v26, %v372_v20  ;;  %v670_v0 = vmul.f32 %v666_v34, %v654_v16 }
 0x14b   :  { %2258 = vtanh.f32 %v658_v2 }
 0x152   :  { %v2253_v28 = vpop.eup %2252 }
 0x153   :  { %v671_v1 = vmul.f32 %v2253_v28, %v651_v10 }
 0x154   :  { %v2255_v35 = vpop.eup %2254 }
 0x155   :  { %v672_v18 = vmul.f32 %v2255_v35, %v653_v37  ;;  %v2791_v39 = vadd.f32 %v671_v1, %v669_v43  ;;  %v3209_v37 = vmov 0  }
 0x156   :  { %v2257_v45 = vpop.eup %2256 }
 0x157   :  { %v2793_v44 = vadd.f32 %v672_v18, %v670_v0  ;;  %2260 = vtanh.f32 %v2791_v39  ;;  %v661_v6 = vadd.f32 1.0, %v2257_v45 }
 0x158   :  { %v2259_v47 = vpop.eup %2258 }
 0x159   :  { %2262 = vtanh.f32 %v2793_v44  ;;  %v662_v7 = vadd.f32 1.0, %v2259_v47  ;;  %v663_v46 = vmul.f32 0.5, %v661_v6 }
 0x15b   :  { %v664_v5 = vmul.f32 0.5, %v662_v7 }
 0x164   :  { %v2261_v9 = vpop.eup %2260 }
 0x165   :  { %v677_v2 = vmul.f32 %v2261_v9, %v663_v46 }
 0x166   :  { %v2263_v20 = vpop.eup %2262 }
 0x167   :  { %v678_v24 = vmul.f32 %v2263_v20, %v664_v5  ;;  %v679_v26 = vpack.c.bf16 %v677_v2, %v677_v2 }
 0x169   :  { %v680_v10 = vpack.c.bf16 %v678_v24, %v678_v24  ;;  %v683_v0 = vunpack.c.l.b16 %v679_v26 }
 0x16b   :  { %v684_v1 = vunpack.c.l.b16 %v680_v10 }
 0x16d   :  { %v685_v16 = vrot.slane %v684_v1, 7 }
 0x16f   :  { %v687_v34 = vsel %vm686_vm3, %v685_v16, %v683_v0 }
 0x170   :  { %v688_v28 = vpack.c.b16 %v687_v34, %v687_v34 }
 0x172   :  { %723 = vmatmul.mubr.bf16.vlgmr.msra.gmra.mxu0 %v688_v28  ;;  %764 = vmatmul.mubr.bf16.vlgmr.msra.gmra.mxu1 %v688_v28 }
 0x173   :  { %849 = vmatpush1.bf16.msra.mxu0 %v2619_v4  ;;  %890 = vmatpush1.bf16.msra.mxu1 %v2678_v49 }
 0x174   :  { %850 = vmatprep.subr.bf16.mxu0 %v2623_v8  ;;  %891 = vmatprep.subr.bf16.mxu1 %v2682_v50 }
 0x175   :  { %880 = vmatprep.mubr.bf16.mxu0 %v3209_v37  ;;  %921 = vmatprep.mubr.bf16.mxu1 %v3209_v37 }
 0x177   :  { %851 = vmatpush1.bf16.msra.mxu0 %v2625_v11  ;;  %892 = vmatpush1.bf16.msra.mxu1 %v2687_v51 }
 0x178   :  { %852 = vmatprep.subr.bf16.mxu0 %v2628_v14  ;;  %893 = vmatprep.subr.bf16.mxu1 %v2691_v52 }
 0x17b   :  { %853 = vmatpush1.bf16.msra.mxu0 %v2631_v15  ;;  %894 = vmatpush1.bf16.msra.mxu1 %v2696_v53 }
 0x17c   :  { %854 = vmatprep.subr.bf16.mxu0 %v2634_v17  ;;  %895 = vmatprep.subr.bf16.mxu1 %v2699_v54 }
 0x17f   :  { %855 = vmatpush1.bf16.msra.mxu0 %v2636_v19  ;;  %896 = vmatpush1.bf16.msra.mxu1 %v2704_v55 }
 0x180   :  { %856 = vmatprep.subr.bf16.mxu0 %v2640_v21  ;;  %897 = vmatprep.subr.bf16.mxu1 %v2707_v56 }
 0x183   :  { %857 = vmatpush1.bf16.msra.mxu0 %v2643_v23  ;;  %898 = vmatpush1.bf16.msra.mxu1 %v2712_v57 }
 0x184   :  { %858 = vmatprep.subr.bf16.mxu0 %v2646_v25  ;;  %899 = vmatprep.subr.bf16.mxu1 %v2715_v58 }
 0x187   :  { %859 = vmatpush1.bf16.msra.mxu0 %v2648_v27  ;;  %900 = vmatpush1.bf16.msra.mxu1 %v2720_v59 }
 0x188   :  { %860 = vmatprep.subr.bf16.mxu0 %v2652_v33  ;;  %901 = vmatprep.subr.bf16.mxu1 %v2723_v60 }
 0x18b   :  { %861 = vmatpush1.bf16.msra.mxu0 %v2655_v36  ;;  %902 = vmatpush1.bf16.msra.mxu1 %v2728_v61 }
 0x18c   :  { %862 = vmatprep.subr.bf16.mxu0 %v2658_v38  ;;  %903 = vmatprep.subr.bf16.mxu1 %v2731_v62 }
 0x18f   :  { %863 = vmatpush1.bf16.msra.mxu0 %v2662_v40  ;;  %904 = vmatpush1.bf16.msra.mxu1 %v2734_v63 }
 0x190   :  { %1011 = vmatprep.subr.bf16.mxu0 %v2617_v3  ;;  %1052 = vmatprep.subr.bf16.mxu1 %v2674_v48 }
 0x232   :  { %v724_v43 = vpop.f32.mrf.mxu0  ;;  %v765_v35 = vpop.f32.mrf.mxu1 }
 0x233   :  { %v776_v18 = vrot.slane %v724_v43, 7  ;;  %v792_v45 = vadd.f32 %v724_v43, %v2773_v41  ;;  %v778_v26 = vrot.slane %v765_v35, 7  ;;  %v794_v34 = vadd.f32 %v765_v35, %v2781_v22 }
 0x234   :  { %v726_v47 = vpop.f32.mrf.mxu0  ;;  %v767_v6 = vpop.f32.mrf.mxu1 }
 0x235   :  { %v788_v7 = vadd.f32 %v776_v18, %v2767_v31  ;;  %v798_v46 = vmul.f32 0.5, %v792_v45  ;;  %v777_v9 = vrot.slane %v726_v47, 7  ;;  %v793_v5 = vadd.f32 %v726_v47, %v2769_v32 }
 0x236   :  { %v728_v2 = vpop.f32.mrf.mxu0  ;;  %v769_v20 = vpop.f32.mrf.mxu1  ;;  %v790_v43 = vadd.f32 %v778_v26, %v2779_v13  ;;  %v779_v18 = vrot.slane %v767_v6, 7  ;;  %v795_v45 = vadd.f32 %v767_v6, %v2787_v42  ;;  %v825_v26 = vrot.slane %v2793_v44, 7 }
 0x237   :  { %v796_v24 = vmul.f32 0.5, %v788_v7  ;;  %2264 = vtanh.f32 %v798_v46  ;;  %v789_v10 = vadd.f32 %v777_v9, %v2765_v29  ;;  %v799_v1 = vmul.f32 0.5, %v793_v5 }
 0x238   :  { %v729_v0 = vpop.f32.mrf.mxu0  ;;  %v770_v16 = vpop.f32.mrf.mxu1  ;;  %v791_v47 = vadd.f32 %v779_v18, %v2784_v30  ;;  %v815_v46 = vmul.f32 0.5, %v795_v45 }
 0x239   :  { %2266 = vtanh.f32 %v796_v24  ;;  %v797_v28 = vmul.f32 0.5, %v789_v10 }
 0x23a   :  { %2268 = vtanh.f32 %v799_v1  ;;  %v814_v2 = vmul.f32 0.5, %v791_v47 }
 0x23b   :  { %2270 = vtanh.f32 %v797_v28 }
 0x23c   :  { %2272 = vtanh.f32 %v794_v34 }
 0x23d   :  { %2274 = vtanh.f32 %v790_v43  ;;  %v824_v43 = vrot.slane %v2791_v39, 7 }
 0x23e   :  { %2276 = vtanh.f32 %v815_v46 }
 0x23f   :  { %2278 = vtanh.f32 %v814_v2 }
 0x244   :  { %v2265_v7 = vpop.eup %2264 }
 0x245   :  { %v806_v9 = vadd.f32 1.0, %v2265_v7 }
 0x246   :  { %v2267_v5 = vpop.eup %2266 }
 0x247   :  { %v2269_v20 = vpop.eup %2268  ;;  %v804_v24 = vadd.f32 1.0, %v2267_v5  ;;  %v810_v35 = vmul.f32 0.5, %v806_v9 }
 0x248   :  { %v807_v10 = vadd.f32 1.0, %v2269_v20  ;;  %v2271_v1 = vpop.eup %2270 }
 0x249   :  { %v808_v0 = vmul.f32 0.5, %v804_v24  ;;  %v805_v16 = vadd.f32 1.0, %v2271_v1  ;;  %v2273_v6 = vpop.eup %2272 }
 0x24a   :  { %v811_v34 = vmul.f32 0.5, %v807_v10  ;;  %v831_v45 = vmul.f32 %v2273_v6, %v810_v35  ;;  %v2275_v7 = vpop.eup %2274 }
 0x24b   :  { %v809_v28 = vmul.f32 0.5, %v805_v16  ;;  %v830_v12 = vmul.f32 %v2275_v7, %v808_v0  ;;  %v2277_v44 = vpop.eup %2276 }
 0x24c   :  { %v829_v18 = vmul.f32 %v825_v26, %v811_v34  ;;  %v2279_v46 = vpop.eup %2278  ;;  %v819_v2 = vadd.f32 1.0, %v2277_v44 }
 0x24d   :  { %v828_v47 = vmul.f32 %v824_v43, %v809_v28  ;;  %v818_v20 = vadd.f32 1.0, %v2279_v46 }
 0x24e   :  { %v2842_v5 = vadd.f32 %v831_v45, %v829_v18  ;;  %v821_v24 = vmul.f32 0.5, %v819_v2 }
 0x24f   :  { %v2844_v9 = vadd.f32 %v830_v12, %v828_v47  ;;  %v820_v39 = vmul.f32 0.5, %v818_v20 }
 0x250   :  { %2280 = vtanh.f32 %v2842_v5 }
 0x251   :  { %2282 = vtanh.f32 %v2844_v9 }
 0x25d   :  { %v2281_v10 = vpop.eup %2280 }
 0x25e   :  { %v837_v1 = vmul.f32 %v2281_v10, %v821_v24  ;;  %v2283_v35 = vpop.eup %2282 }
 0x25f   :  { %v836_v26 = vmul.f32 %v2283_v35, %v820_v39 }
 0x260   :  { %v839_v0 = vpack.c.bf16 %v837_v1, %v837_v1 }
 0x261   :  { %v838_v16 = vpack.c.bf16 %v836_v26, %v836_v26 }
 0x262   :  { %v843_v6 = vunpack.c.l.b16 %v839_v0 }
 0x263   :  { %v842_v34 = vunpack.c.l.b16 %v838_v16 }
 0x265   :  { %v844_v12 = vrot.slane %v842_v34, 1 }
 0x267   :  { %v845_v28 = vsel %vm686_vm3, %v843_v6, %v844_v12 }
 0x268   :  { %v846_v43 = vpack.c.b16 %v845_v28, %v845_v28 }
 0x26a   :  { %881 = vmatmul.mubr.bf16.vlgmr.msra.gmra.mxu0 %v846_v43  ;;  %922 = vmatmul.mubr.bf16.vlgmr.msra.gmra.mxu1 %v846_v43 }
 0x26b   :  { %1012 = vmatpush1.bf16.msra.mxu0 %v2619_v4  ;;  %1053 = vmatpush1.bf16.msra.mxu1 %v2678_v49 }
 0x26c   :  { %1013 = vmatprep.subr.bf16.mxu0 %v2623_v8  ;;  %1054 = vmatprep.subr.bf16.mxu1 %v2682_v50 }
 0x26d   :  { %1043 = vmatprep.mubr.bf16.mxu0 %v3209_v37  ;;  %1084 = vmatprep.mubr.bf16.mxu1 %v3209_v37 }
 0x26f   :  { %1014 = vmatpush1.bf16.msra.mxu0 %v2625_v11  ;;  %1055 = vmatpush1.bf16.msra.mxu1 %v2687_v51 }
 0x270   :  { %1015 = vmatprep.subr.bf16.mxu0 %v2628_v14  ;;  %1056 = vmatprep.subr.bf16.mxu1 %v2691_v52 }
 0x273   :  { %1016 = vmatpush1.bf16.msra.mxu0 %v2631_v15  ;;  %1057 = vmatpush1.bf16.msra.mxu1 %v2696_v53 }
 0x274   :  { %1017 = vmatprep.subr.bf16.mxu0 %v2634_v17  ;;  %1058 = vmatprep.subr.bf16.mxu1 %v2699_v54 }
 0x277   :  { %1018 = vmatpush1.bf16.msra.mxu0 %v2636_v19  ;;  %1059 = vmatpush1.bf16.msra.mxu1 %v2704_v55 }
 0x278   :  { %1019 = vmatprep.subr.bf16.mxu0 %v2640_v21  ;;  %1060 = vmatprep.subr.bf16.mxu1 %v2707_v56 }
 0x27b   :  { %1020 = vmatpush1.bf16.msra.mxu0 %v2643_v23  ;;  %1061 = vmatpush1.bf16.msra.mxu1 %v2712_v57 }
 0x27c   :  { %1021 = vmatprep.subr.bf16.mxu0 %v2646_v25  ;;  %1062 = vmatprep.subr.bf16.mxu1 %v2715_v58 }
 0x27f   :  { %1022 = vmatpush1.bf16.msra.mxu0 %v2648_v27  ;;  %1063 = vmatpush1.bf16.msra.mxu1 %v2720_v59 }
 0x280   :  { %1023 = vmatprep.subr.bf16.mxu0 %v2652_v33  ;;  %1064 = vmatprep.subr.bf16.mxu1 %v2723_v60 }
 0x283   :  { %1024 = vmatpush1.bf16.msra.mxu0 %v2655_v36  ;;  %1065 = vmatpush1.bf16.msra.mxu1 %v2728_v61 }
 0x284   :  { %1025 = vmatprep.subr.bf16.mxu0 %v2658_v38  ;;  %1066 = vmatprep.subr.bf16.mxu1 %v2731_v62 }
 0x287   :  { %1026 = vmatpush1.bf16.msra.mxu0 %v2662_v40  ;;  %1067 = vmatpush1.bf16.msra.mxu1 %v2734_v63 }
 0x288   :  { %1174 = vmatprep.subr.bf16.mxu0 %v2617_v3  ;;  %1215 = vmatprep.subr.bf16.mxu1 %v2674_v48 }
 0x32a   :  { %v882_v4 = vpop.f32.mrf.mxu0  ;;  %v923_v8 = vpop.f32.mrf.mxu1 }
 0x32b   :  { %v934_v11 = vrot.slane %v882_v4, 6  ;;  %v938_v14 = vrot.slane %v882_v4, 7  ;;  %v936_v47 = vrot.slane %v923_v8, 6  ;;  %v940_v20 = vrot.slane %v923_v8, 7 }
 0x32c   :  { %v884_v15 = vpop.f32.mrf.mxu0  ;;  %v925_v17 = vpop.f32.mrf.mxu1 }
 0x32d   :  { %v950_v19 = vadd.f32 %v934_v11, %v2767_v31  ;;  %v954_v21 = vadd.f32 %v938_v14, %v2773_v41  ;;  %v935_v23 = vrot.slane %v884_v15, 6  ;;  %v939_v25 = vrot.slane %v884_v15, 7 }
 0x32e   :  { %v886_v27 = vpop.f32.mrf.mxu0  ;;  %v927_v18 = vpop.f32.mrf.mxu1  ;;  %v952_v39 = vadd.f32 %v936_v47, %v2779_v13  ;;  %v956_v1 = vadd.f32 %v940_v20, %v2781_v22  ;;  %v937_v35 = vrot.slane %v925_v17, 6  ;;  %v941_v26 = vrot.slane %v925_v17, 7 }
 0x32f   :  { %v958_v45 = vmul.f32 0.5, %v950_v19  ;;  %v960_v7 = vmul.f32 0.5, %v954_v21  ;;  %v951_v3 = vadd.f32 %v935_v23, %v2765_v29  ;;  %v955_v44 = vadd.f32 %v939_v25, %v2769_v32 }
 0x330   :  { %v887_v46 = vpop.f32.mrf.mxu0  ;;  %v928_v2 = vpop.f32.mrf.mxu1  ;;  %v953_v16 = vadd.f32 %v937_v35, %v2784_v30  ;;  %v957_v0 = vadd.f32 %v941_v26, %v2787_v42  ;;  %v986_v23 = vrot.slane %v2844_v9, 7  ;;  %v987_v18 = vrot.slane %v2842_v5, 7 }
 0x331   :  { %2284 = vtanh.f32 %v958_v45  ;;  %v959_v24 = vmul.f32 0.5, %v951_v3  ;;  %v961_v10 = vmul.f32 0.5, %v955_v44 }
 0x332   :  { %2286 = vtanh.f32 %v960_v7  ;;  %v976_v6 = vmul.f32 0.5, %v953_v16  ;;  %v977_v43 = vmul.f32 0.5, %v957_v0 }
 0x333   :  { %2288 = vtanh.f32 %v959_v24 }
 0x334   :  { %2290 = vtanh.f32 %v961_v10 }
 0x335   :  { %2292 = vtanh.f32 %v952_v39 }
 0x336   :  { %2294 = vtanh.f32 %v956_v1 }
 0x337   :  { %2296 = vtanh.f32 %v976_v6 }
 0x338   :  { %2298 = vtanh.f32 %v977_v43 }
 0x33e   :  { %v2285_v34 = vpop.eup %2284 }
 0x33f   :  { %v2287_v12 = vpop.eup %2286  ;;  %v966_v28 = vadd.f32 1.0, %v2285_v34 }
 0x340   :  { %v968_v4 = vadd.f32 1.0, %v2287_v12  ;;  %v2289_v8 = vpop.eup %2288 }
 0x341   :  { %v2291_v11 = vpop.eup %2290  ;;  %v970_v14 = vmul.f32 0.5, %v966_v28  ;;  %v967_v15 = vadd.f32 1.0, %v2289_v8 }
 0x342   :  { %v972_v19 = vmul.f32 0.5, %v968_v4  ;;  %v969_v21 = vadd.f32 1.0, %v2291_v11  ;;  %v2293_v25 = vpop.eup %2292  ;;  %v2900_v11 = vld [vmem:[#allocation9 + $0xe0] ss:$16 sps:$4 sm:$0xff]  }
 0x343   :  { %v971_v17 = vmul.f32 0.5, %v967_v15  ;;  %v2295_v45 = vpop.eup %2294  ;;  %v992_v47 = vmul.f32 %v2293_v25, %v970_v14  ;;  %v2904_v14 = vld [vmem:[#allocation9 + $0xc4] ss:$16 sps:$4 sm:$0xff]   ;;  %v2910_v15 = vld [vmem:[#allocation9 + $0xc0] ss:$16 sps:$4 sm:$0xff]  }
 0x344   :  { %v973_v27 = vmul.f32 0.5, %v969_v21  ;;  %v993_v44 = vmul.f32 %v2295_v45, %v972_v19  ;;  %v2297_v20 = vpop.eup %2296  ;;  %v2914_v19 = vld [vmem:[#allocation9 + $0xa4] ss:$16 sps:$4 sm:$0xff]   ;;  %v2926_v21 = vld [vmem:[#allocation9 + $0x80] ss:$16 sps:$4 sm:$0xff]  }
 0x345   :  { %v990_v7 = vmul.f32 %v986_v23, %v971_v17  ;;  %v2299_v24 = vpop.eup %2298  ;;  %v980_v9 = vadd.f32 1.0, %v2297_v20  ;;  %v2938_v17 = vld [vmem:[#allocation9 + $0x44] ss:$16 sps:$4 sm:$0xff]   ;;  %v2942_v23 = vld [vmem:[#allocation9 + $0x40] ss:$16 sps:$4 sm:$0xff]  }
 0x346   :  { %v991_v3 = vmul.f32 %v987_v18, %v973_v27  ;;  %v981_v10 = vadd.f32 1.0, %v2299_v24  ;;  %v2954_v25 = vld [vmem:[#allocation9 + $0xe4] ss:$16 sps:$4 sm:$0xff]  }
 0x347   :  { %v2893_v46 = vadd.f32 %v992_v47, %v990_v7  ;;  %v982_v39 = vmul.f32 0.5, %v980_v9 }
 0x348   :  { %v2895_v2 = vadd.f32 %v993_v44, %v991_v3  ;;  %v983_v5 = vmul.f32 0.5, %v981_v10 }
 0x349   :  { %2300 = vtanh.f32 %v2893_v46 }
 0x34a   :  { %2302 = vtanh.f32 %v2895_v2 }
 0x356   :  { %v2301_v1 = vpop.eup %2300 }
 0x357   :  { %v2303_v35 = vpop.eup %2302  ;;  %v998_v26 = vmul.f32 %v2301_v1, %v982_v39 }
 0x358   :  { %v999_v16 = vmul.f32 %v2303_v35, %v983_v5 }
 0x359   :  { %v1000_v0 = vpack.c.bf16 %v998_v26, %v998_v26 }
 0x35a   :  { %v1001_v34 = vpack.c.bf16 %v999_v16, %v999_v16 }
 0x35b   :  { %v1004_v6 = vunpack.c.l.b16 %v1000_v0 }
 0x35c   :  { %v1005_v12 = vunpack.c.l.b16 %v1001_v34 }
 0x35d   :  { %v1006_v28 = vrot.slane %v1004_v6, 2 }
 0x35e   :  { %v1007_v43 = vrot.slane %v1005_v12, 1 }
 0x360   :  { %v1008_v4 = vsel %vm686_vm3, %v1007_v43, %v1006_v28 }
 0x361   :  { %v1009_v8 = vpack.c.b16 %v1008_v4, %v1008_v4 }
 0x363   :  { %1044 = vmatmul.mubr.bf16.vlgmr.msra.gmra.mxu0 %v1009_v8  ;;  %1085 = vmatmul.mubr.bf16.vlgmr.msra.gmra.mxu1 %v1009_v8 }
 0x364   :  { %1175 = vmatpush1.bf16.msra.mxu0 %v2900_v11  ;;  %1216 = vmatpush1.bf16.msra.mxu1 %v2678_v49  ;;  %v2918_v49 = vld [vmem:[#allocation9 + $0xa0] ss:$16 sps:$4 sm:$0xff]  }
 0x365   :  { %1176 = vmatprep.subr.bf16.mxu0 %v2904_v14  ;;  %1217 = vmatprep.subr.bf16.mxu1 %v2682_v50  ;;  %v2922_v50 = vld [vmem:[#allocation9 + $0x84] ss:$16 sps:$4 sm:$0xff]  }
 0x366   :  { %1206 = vmatprep.mubr.bf16.mxu0 %v3209_v37  ;;  %1247 = vmatprep.mubr.bf16.mxu1 %v3209_v37 }
 0x368   :  { %1177 = vmatpush1.bf16.msra.mxu0 %v2910_v15  ;;  %1218 = vmatpush1.bf16.msra.mxu1 %v2687_v51  ;;  %v2930_v51 = vld [vmem:[#allocation9 + $0x64] ss:$16 sps:$4 sm:$0xff]  }
 0x369   :  { %1178 = vmatprep.subr.bf16.mxu0 %v2914_v19  ;;  %1219 = vmatprep.subr.bf16.mxu1 %v2691_v52  ;;  %v2934_v52 = vld [vmem:[#allocation9 + $0x60] ss:$16 sps:$4 sm:$0xff]  }
 0x36c   :  { %1179 = vmatpush1.bf16.msra.mxu0 %v2918_v49  ;;  %1220 = vmatpush1.bf16.msra.mxu1 %v2696_v53 }
 0x36d   :  { %1180 = vmatprep.subr.bf16.mxu0 %v2922_v50  ;;  %1221 = vmatprep.subr.bf16.mxu1 %v2699_v54 }
 0x370   :  { %1181 = vmatpush1.bf16.msra.mxu0 %v2926_v21  ;;  %1222 = vmatpush1.bf16.msra.mxu1 %v2704_v55 }
 0x371   :  { %1182 = vmatprep.subr.bf16.mxu0 %v2930_v51  ;;  %1223 = vmatprep.subr.bf16.mxu1 %v2707_v56 }
 0x374   :  { %1183 = vmatpush1.bf16.msra.mxu0 %v2934_v52  ;;  %1224 = vmatpush1.bf16.msra.mxu1 %v2712_v57 }
 0x375   :  { %1184 = vmatprep.subr.bf16.mxu0 %v2938_v17  ;;  %1225 = vmatprep.subr.bf16.mxu1 %v2715_v58 }
 0x378   :  { %1185 = vmatpush1.bf16.msra.mxu0 %v2942_v23  ;;  %1226 = vmatpush1.bf16.msra.mxu1 %v2720_v59 }
 0x379   :  { %1186 = vmatprep.subr.bf16.mxu0 %v2652_v33  ;;  %1227 = vmatprep.subr.bf16.mxu1 %v2723_v60 }
 0x37c   :  { %1187 = vmatpush1.bf16.msra.mxu0 %v2655_v36  ;;  %1228 = vmatpush1.bf16.msra.mxu1 %v2728_v61 }
 0x37d   :  { %1188 = vmatprep.subr.bf16.mxu0 %v2658_v38  ;;  %1229 = vmatprep.subr.bf16.mxu1 %v2731_v62 }
 0x380   :  { %1189 = vmatpush1.bf16.msra.mxu0 %v2662_v40  ;;  %1230 = vmatpush1.bf16.msra.mxu1 %v2734_v63 }
 0x381   :  { %1337 = vmatprep.subr.bf16.mxu0 %v2954_v25  ;;  %1378 = vmatprep.subr.bf16.mxu1 %v2674_v48 }
 0x423   :  { %v1045_v33 = vpop.f32.mrf.mxu0  ;;  %v1086_v27 = vpop.f32.mrf.mxu1 }
 0x424   :  { %v1097_v18 = vrot.slane %v1045_v33, 5  ;;  %v1101_v36 = vrot.slane %v1045_v33, 6  ;;  %v1099_v10 = vrot.slane %v1086_v27, 5  ;;  %v1103_v35 = vrot.slane %v1086_v27, 6 }
 0x425   :  { %v1047_v45 = vpop.f32.mrf.mxu0  ;;  %v1088_v7 = vpop.f32.mrf.mxu1 }
 0x426   :  { %v1113_v38 = vadd.f32 %v1097_v18, %v2767_v31  ;;  %v1117_v47 = vadd.f32 %v1101_v36, %v2773_v41  ;;  %v1098_v3 = vrot.slane %v1047_v45, 5  ;;  %v1102_v40 = vrot.slane %v1047_v45, 6 }
 0x427   :  { %v1049_v44 = vpop.f32.mrf.mxu0  ;;  %v1090_v20 = vpop.f32.mrf.mxu1  ;;  %v1115_v0 = vadd.f32 %v1099_v10, %v2779_v13  ;;  %v1119_v34 = vadd.f32 %v1103_v35, %v2781_v22  ;;  %v1100_v6 = vrot.slane %v1088_v7, 5  ;;  %v1104_v12 = vrot.slane %v1088_v7, 6 }
 0x428   :  { %v1121_v24 = vmul.f32 0.5, %v1113_v38  ;;  %v1123_v9 = vmul.f32 0.5, %v1117_v47  ;;  %v1114_v39 = vadd.f32 %v1098_v3, %v2765_v29  ;;  %v1118_v48 = vadd.f32 %v1102_v40, %v2769_v32 }
 0x429   :  { %v1050_v1 = vpop.f32.mrf.mxu0  ;;  %v1091_v5 = vpop.f32.mrf.mxu1  ;;  %v1116_v28 = vadd.f32 %v1100_v6, %v2784_v30  ;;  %v1120_v43 = vadd.f32 %v1104_v12, %v2787_v42  ;;  %v1149_v20 = vrot.slane %v2893_v46, 7  ;;  %v1150_v10 = vrot.slane %v2895_v2, 7 }
 0x42a   :  { %2304 = vtanh.f32 %v1121_v24  ;;  %v1122_v26 = vmul.f32 0.5, %v1114_v39  ;;  %v1124_v16 = vmul.f32 0.5, %v1118_v48 }
 0x42b   :  { %2306 = vtanh.f32 %v1123_v9  ;;  %v1139_v8 = vmul.f32 0.5, %v1116_v28  ;;  %v1140_v18 = vmul.f32 0.5, %v1120_v43 }
 0x42c   :  { %2308 = vtanh.f32 %v1122_v26 }
 0x42d   :  { %2310 = vtanh.f32 %v1124_v16 }
 0x42e   :  { %2312 = vtanh.f32 %v1115_v0 }
 0x42f   :  { %2314 = vtanh.f32 %v1119_v34 }
 0x430   :  { %2316 = vtanh.f32 %v1139_v8 }
 0x431   :  { %2318 = vtanh.f32 %v1140_v18 }
 0x437   :  { %v2305_v4 = vpop.eup %2304 }
 0x438   :  { %v2307_v33 = vpop.eup %2306  ;;  %v1129_v27 = vadd.f32 1.0, %v2305_v4 }
 0x439   :  { %v1131_v36 = vadd.f32 1.0, %v2307_v33  ;;  %v2309_v45 = vpop.eup %2308 }
 0x43a   :  { %v2311_v38 = vpop.eup %2310  ;;  %v1133_v47 = vmul.f32 0.5, %v1129_v27  ;;  %v1130_v3 = vadd.f32 1.0, %v2309_v45 }
 0x43b   :  { %v1135_v40 = vmul.f32 0.5, %v1131_v36  ;;  %v1132_v44 = vadd.f32 1.0, %v2311_v38  ;;  %v2313_v24 = vpop.eup %2312 }
 0x43c   :  { %v1134_v7 = vmul.f32 0.5, %v1130_v3  ;;  %v2315_v39 = vpop.eup %2314  ;;  %v1155_v1 = vmul.f32 %v2313_v24, %v1133_v47 }
 0x43d   :  { %v1136_v9 = vmul.f32 0.5, %v1132_v44  ;;  %v1156_v35 = vmul.f32 %v2315_v39, %v1135_v40  ;;  %v2317_v0 = vpop.eup %2316  ;;  %v2976_v40 = vld [vmem:[#allocation9 + $0xe8] ss:$16 sps:$4 sm:$0xff]   ;;  %v2980_v44 = vld [vmem:[#allocation9 + $0xcc] ss:$16 sps:$4 sm:$0xff]  }
 0x43e   :  { %v1153_v48 = vmul.f32 %v1149_v20, %v1134_v7  ;;  %v2319_v34 = vpop.eup %2318  ;;  %v1143_v46 = vadd.f32 1.0, %v2317_v0  ;;  %v2986_v7 = vld [vmem:[#allocation9 + $0xc8] ss:$16 sps:$4 sm:$0xff]   ;;  %v2990_v20 = vld [vmem:[#allocation9 + $0xac] ss:$16 sps:$4 sm:$0xff]  }
 0x43f   :  { %v1154_v5 = vmul.f32 %v1150_v10, %v1136_v9  ;;  %v1144_v6 = vadd.f32 1.0, %v2319_v34 }
 0x440   :  { %v2968_v26 = vadd.f32 %v1155_v1, %v1153_v48  ;;  %v1145_v12 = vmul.f32 0.5, %v1143_v46 }
 0x441   :  { %v2970_v16 = vadd.f32 %v1156_v35, %v1154_v5  ;;  %v1146_v2 = vmul.f32 0.5, %v1144_v6 }
 0x442   :  { %2320 = vtanh.f32 %v2968_v26 }
 0x443   :  { %2322 = vtanh.f32 %v2970_v16 }
 0x44f   :  { %v2321_v28 = vpop.eup %2320 }
 0x450   :  { %v2323_v43 = vpop.eup %2322  ;;  %v1161_v4 = vmul.f32 %v2321_v28, %v1145_v12 }
 0x451   :  { %v1162_v8 = vmul.f32 %v2323_v43, %v1146_v2 }
 0x452   :  { %v1163_v33 = vpack.c.bf16 %v1161_v4, %v1161_v4 }
 0x453   :  { %v1164_v27 = vpack.c.bf16 %v1162_v8, %v1162_v8 }
 0x454   :  { %v1167_v18 = vunpack.c.l.b16 %v1163_v33 }
 0x455   :  { %v1168_v36 = vunpack.c.l.b16 %v1164_v27 }
 0x456   :  { %v1169_v45 = vrot.slane %v1167_v18, 3 }
 0x457   :  { %v1170_v38 = vrot.slane %v1168_v36, 2 }
 0x459   :  { %v1171_v47 = vsel %vm686_vm3, %v1170_v38, %v1169_v45 }
 0x45a   :  { %v1172_v3 = vpack.c.b16 %v1171_v47, %v1171_v47 }
 0x45c   :  { %1207 = vmatmul.mubr.bf16.vlgmr.msra.gmra.mxu0 %v1172_v3  ;;  %1248 = vmatmul.mubr.bf16.vlgmr.msra.gmra.mxu1 %v1172_v3 }
 0x45d   :  { %1338 = vmatpush1.bf16.msra.mxu0 %v2900_v11  ;;  %1379 = vmatpush1.bf16.msra.mxu1 %v2976_v40 }
 0x45e   :  { %1339 = vmatprep.subr.bf16.mxu0 %v2904_v14  ;;  %1380 = vmatprep.subr.bf16.mxu1 %v2980_v44 }
 0x45f   :  { %1369 = vmatprep.mubr.bf16.mxu0 %v3209_v37  ;;  %1410 = vmatprep.mubr.bf16.mxu1 %v3209_v37 }
 0x461   :  { %1340 = vmatpush1.bf16.msra.mxu0 %v2910_v15  ;;  %1381 = vmatpush1.bf16.msra.mxu1 %v2986_v7 }
 0x462   :  { %1341 = vmatprep.subr.bf16.mxu0 %v2914_v19  ;;  %1382 = vmatprep.subr.bf16.mxu1 %v2990_v20 }
 0x465   :  { %1342 = vmatpush1.bf16.msra.mxu0 %v2918_v49  ;;  %1383 = vmatpush1.bf16.msra.mxu1 %v2696_v53  ;;  %v3007_v53 = vld [vmem:[#allocation9 + $0x24] ss:$16 sps:$4 sm:$0xff]  }
 0x466   :  { %1343 = vmatprep.subr.bf16.mxu0 %v2922_v50  ;;  %1384 = vmatprep.subr.bf16.mxu1 %v2699_v54  ;;  %v3011_v54 = vld [vmem:[#allocation9 + $0x20] ss:$16 sps:$4 sm:$0xff]  }
 0x469   :  { %1344 = vmatpush1.bf16.msra.mxu0 %v2926_v21  ;;  %1385 = vmatpush1.bf16.msra.mxu1 %v2704_v55  ;;  %v3015_v55 = vld [vmem:[#allocation9 + $0x4] ss:$16 sps:$4 sm:$0xff]  }
 0x46a   :  { %1345 = vmatprep.subr.bf16.mxu0 %v2930_v51  ;;  %1386 = vmatprep.subr.bf16.mxu1 %v2707_v56  ;;  %v3019_v56 = vld [vmem:[#allocation9] ss:$16 sps:$4 sm:$0xff]  }
 0x46d   :  { %1346 = vmatpush1.bf16.msra.mxu0 %v2934_v52  ;;  %1387 = vmatpush1.bf16.msra.mxu1 %v2712_v57  ;;  %v3024_v57 = vld [vmem:[#allocation9 + $0xec] ss:$16 sps:$4 sm:$0xff]  }
 0x46e   :  { %1347 = vmatprep.subr.bf16.mxu0 %v2938_v17  ;;  %1388 = vmatprep.subr.bf16.mxu1 %v2715_v58 }
 0x471   :  { %1348 = vmatpush1.bf16.msra.mxu0 %v2942_v23  ;;  %1389 = vmatpush1.bf16.msra.mxu1 %v2720_v59 }
 0x472   :  { %1349 = vmatprep.subr.bf16.mxu0 %v3007_v53  ;;  %1390 = vmatprep.subr.bf16.mxu1 %v2723_v60 }
 0x475   :  { %1350 = vmatpush1.bf16.msra.mxu0 %v3011_v54  ;;  %1391 = vmatpush1.bf16.msra.mxu1 %v2728_v61 }
 0x476   :  { %1351 = vmatprep.subr.bf16.mxu0 %v3015_v55  ;;  %1392 = vmatprep.subr.bf16.mxu1 %v2731_v62 }
 0x479   :  { %1352 = vmatpush1.bf16.msra.mxu0 %v3019_v56  ;;  %1393 = vmatpush1.bf16.msra.mxu1 %v2734_v63 }
 0x47a   :  { %1500 = vmatprep.subr.bf16.mxu0 %v2954_v25  ;;  %1541 = vmatprep.subr.bf16.mxu1 %v3024_v57 }
 0x51c   :  { %v1208_v58 = vpop.f32.mrf.mxu0  ;;  %v1249_v59 = vpop.f32.mrf.mxu1 }
 0x51d   :  { %v1260_v60 = vrot.slane %v1208_v58, 4  ;;  %v1264_v61 = vrot.slane %v1208_v58, 5  ;;  %v1262_v0 = vrot.slane %v1249_v59, 4  ;;  %v1266_v28 = vrot.slane %v1249_v59, 5 }
 0x51e   :  { %v1210_v24 = vpop.f32.mrf.mxu0  ;;  %v1251_v9 = vpop.f32.mrf.mxu1 }
 0x51f   :  { %v1276_v62 = vadd.f32 %v1260_v60, %v2767_v31  ;;  %v1280_v10 = vadd.f32 %v1264_v61, %v2773_v41  ;;  %v1261_v39 = vrot.slane %v1210_v24, 4  ;;  %v1265_v48 = vrot.slane %v1210_v24, 5 }
 0x520   :  { %v1212_v1 = vpop.f32.mrf.mxu0  ;;  %v1253_v63 = vpop.f32.mrf.mxu1  ;;  %v1278_v4 = vadd.f32 %v1262_v0, %v2779_v13  ;;  %v1282_v8 = vadd.f32 %v1266_v28, %v2781_v22  ;;  %v1263_v33 = vrot.slane %v1251_v9, 4  ;;  %v1267_v27 = vrot.slane %v1251_v9, 5 }
 0x521   :  { %v1284_v5 = vmul.f32 0.5, %v1276_v62  ;;  %v1286_v35 = vmul.f32 0.5, %v1280_v10  ;;  %v1277_v34 = vadd.f32 %v1261_v39, %v2765_v29  ;;  %v1281_v46 = vadd.f32 %v1265_v48, %v2769_v32 }
 0x522   :  { %v1213_v6 = vpop.f32.mrf.mxu0  ;;  %v1254_v12 = vpop.f32.mrf.mxu1  ;;  %v1279_v18 = vadd.f32 %v1263_v33, %v2784_v30  ;;  %v1283_v36 = vadd.f32 %v1267_v27, %v2787_v42  ;;  %v1312_v48 = vrot.slane %v2968_v26, 7 }
 0x523   :  { %2324 = vtanh.f32 %v1284_v5  ;;  %v1285_v2 = vmul.f32 0.5, %v1277_v34  ;;  %v1287_v43 = vmul.f32 0.5, %v1281_v46  ;;  %v1313_v5 = vrot.slane %v2970_v16, 7 }
 0x524   :  { %2326 = vtanh.f32 %v1286_v35  ;;  %v1302_v38 = vmul.f32 0.5, %v1279_v18  ;;  %v1303_v58 = vmul.f32 0.5, %v1283_v36 }
 0x525   :  { %2328 = vtanh.f32 %v1285_v2 }
 0x526   :  { %2330 = vtanh.f32 %v1287_v43 }
 0x527   :  { %2332 = vtanh.f32 %v1278_v4 }
 0x528   :  { %2334 = vtanh.f32 %v1282_v8 }
 0x529   :  { %2336 = vtanh.f32 %v1302_v38 }
 0x52a   :  { %2338 = vtanh.f32 %v1303_v58 }
 0x530   :  { %v2325_v45 = vpop.eup %2324 }
 0x531   :  { %v2327_v47 = vpop.eup %2326  ;;  %v1292_v3 = vadd.f32 1.0, %v2325_v45 }
 0x532   :  { %v1294_v59 = vadd.f32 1.0, %v2327_v47  ;;  %v2329_v60 = vpop.eup %2328 }
 0x533   :  { %v2331_v61 = vpop.eup %2330  ;;  %v1296_v24 = vmul.f32 0.5, %v1292_v3  ;;  %v1293_v62 = vadd.f32 1.0, %v2329_v60 }
 0x534   :  { %v1298_v10 = vmul.f32 0.5, %v1294_v59  ;;  %v1295_v39 = vadd.f32 1.0, %v2331_v61  ;;  %v2333_v1 = vpop.eup %2332 }
 0x535   :  { %v1297_v9 = vmul.f32 0.5, %v1293_v62  ;;  %v2335_v35 = vpop.eup %2334  ;;  %v1318_v34 = vmul.f32 %v2333_v1, %v1296_v24  ;;  %v3055_v24 = vld [vmem:[#allocation9 + $0xa8] ss:$16 sps:$4 sm:$0xff]   ;;  %v3059_v62 = vld [vmem:[#allocation9 + $0x8c] ss:$16 sps:$4 sm:$0xff]  }
 0x536   :  { %v1299_v63 = vmul.f32 0.5, %v1295_v39  ;;  %v1319_v6 = vmul.f32 %v2335_v35, %v1298_v10  ;;  %v2337_v2 = vpop.eup %2336  ;;  %v3063_v10 = vld [vmem:[#allocation9 + $0x88] ss:$16 sps:$4 sm:$0xff]   ;;  %v3067_v39 = vld [vmem:[#allocation9 + $0x6c] ss:$16 sps:$4 sm:$0xff]  }
 0x537   :  { %v1316_v0 = vmul.f32 %v1312_v48, %v1297_v9  ;;  %v2339_v43 = vpop.eup %2338  ;;  %v1306_v26 = vadd.f32 1.0, %v2337_v2  ;;  %v3071_v9 = vld [vmem:[#allocation9 + $0x68] ss:$16 sps:$4 sm:$0xff]   ;;  %v3075_v48 = vld [vmem:[#allocation9 + $0x4c] ss:$16 sps:$4 sm:$0xff]  }
 0x538   :  { %v1317_v46 = vmul.f32 %v1313_v5, %v1299_v63  ;;  %v1307_v4 = vadd.f32 1.0, %v2339_v43  ;;  %v3079_v1 = vld [vmem:[#allocation9 + $0x48] ss:$16 sps:$4 sm:$0xff]   ;;  %v3083_v63 = vld [vmem:[#allocation9 + $0x2c] ss:$16 sps:$4 sm:$0xff]  }
 0x539   :  { %v3037_v12 = vadd.f32 %v1318_v34, %v1316_v0  ;;  %v1308_v8 = vmul.f32 0.5, %v1306_v26  ;;  %v3087_v5 = vld [vmem:[#allocation9 + $0x28] ss:$16 sps:$4 sm:$0xff]   ;;  %v3091_v35 = vld [vmem:[#allocation9 + $0xc] ss:$16 sps:$4 sm:$0xff]  }
 0x53a   :  { %v3039_v28 = vadd.f32 %v1319_v6, %v1317_v46  ;;  %v1309_v16 = vmul.f32 0.5, %v1307_v4  ;;  %v3095_v0 = vld [vmem:[#allocation9 + $0x8] ss:$16 sps:$4 sm:$0xff]  }
 0x53b   :  { %2340 = vtanh.f32 %v3037_v12 }
 0x53c   :  { %2342 = vtanh.f32 %v3039_v28 }
 0x548   :  { %v2341_v33 = vpop.eup %2340 }
 0x549   :  { %v2343_v27 = vpop.eup %2342  ;;  %v1324_v18 = vmul.f32 %v2341_v33, %v1308_v8 }
 0x54a   :  { %v1325_v36 = vmul.f32 %v2343_v27, %v1309_v16 }
 0x54b   :  { %v1326_v45 = vpack.c.bf16 %v1324_v18, %v1324_v18 }
 0x54c   :  { %v1327_v38 = vpack.c.bf16 %v1325_v36, %v1325_v36 }
 0x54d   :  { %v1330_v47 = vunpack.c.l.b16 %v1326_v45 }
 0x54e   :  { %v1331_v3 = vunpack.c.l.b16 %v1327_v38 }
 0x54f   :  { %v1332_v58 = vrot.slane %v1330_v47, 4 }
 0x550   :  { %v1333_v59 = vrot.slane %v1331_v3, 3 }
 0x552   :  { %v1334_v60 = vsel %vm686_vm3, %v1333_v59, %v1332_v58 }
 0x553   :  { %v1335_v61 = vpack.c.b16 %v1334_v60, %v1334_v60 }
 0x555   :  { %1370 = vmatmul.mubr.bf16.vlgmr.msra.gmra.mxu0 %v1335_v61  ;;  %1411 = vmatmul.mubr.bf16.vlgmr.msra.gmra.mxu1 %v1335_v61 }
 0x556   :  { %1501 = vmatpush1.bf16.msra.mxu0 %v2900_v11  ;;  %1542 = vmatpush1.bf16.msra.mxu1 %v2976_v40 }
 0x557   :  { %1502 = vmatprep.subr.bf16.mxu0 %v2904_v14  ;;  %1543 = vmatprep.subr.bf16.mxu1 %v2980_v44 }
 0x558   :  { %1532 = vmatprep.mubr.bf16.mxu0 %v3209_v37  ;;  %1573 = vmatprep.mubr.bf16.mxu1 %v3209_v37 }
 0x55a   :  { %1503 = vmatpush1.bf16.msra.mxu0 %v2910_v15  ;;  %1544 = vmatpush1.bf16.msra.mxu1 %v2986_v7 }
 0x55b   :  { %1504 = vmatprep.subr.bf16.mxu0 %v2914_v19  ;;  %1545 = vmatprep.subr.bf16.mxu1 %v2990_v20 }
 0x55e   :  { %1505 = vmatpush1.bf16.msra.mxu0 %v2918_v49  ;;  %1546 = vmatpush1.bf16.msra.mxu1 %v3055_v24 }
 0x55f   :  { %1506 = vmatprep.subr.bf16.mxu0 %v2922_v50  ;;  %1547 = vmatprep.subr.bf16.mxu1 %v3059_v62 }
 0x562   :  { %1507 = vmatpush1.bf16.msra.mxu0 %v2926_v21  ;;  %1548 = vmatpush1.bf16.msra.mxu1 %v3063_v10 }
 0x563   :  { %1508 = vmatprep.subr.bf16.mxu0 %v2930_v51  ;;  %1549 = vmatprep.subr.bf16.mxu1 %v3067_v39 }
 0x566   :  { %1509 = vmatpush1.bf16.msra.mxu0 %v2934_v52  ;;  %1550 = vmatpush1.bf16.msra.mxu1 %v3071_v9 }
 0x567   :  { %1510 = vmatprep.subr.bf16.mxu0 %v2938_v17  ;;  %1551 = vmatprep.subr.bf16.mxu1 %v3075_v48 }
 0x56a   :  { %1511 = vmatpush1.bf16.msra.mxu0 %v2942_v23  ;;  %1552 = vmatpush1.bf16.msra.mxu1 %v3079_v1 }
 0x56b   :  { %1512 = vmatprep.subr.bf16.mxu0 %v3007_v53  ;;  %1553 = vmatprep.subr.bf16.mxu1 %v3083_v63 }
 0x56e   :  { %1513 = vmatpush1.bf16.msra.mxu0 %v3011_v54  ;;  %1554 = vmatpush1.bf16.msra.mxu1 %v3087_v5 }
 0x56f   :  { %1514 = vmatprep.subr.bf16.mxu0 %v3015_v55  ;;  %1555 = vmatprep.subr.bf16.mxu1 %v3091_v35 }
 0x572   :  { %1515 = vmatpush1.bf16.msra.mxu0 %v3019_v56  ;;  %1556 = vmatpush1.bf16.msra.mxu1 %v3095_v0 }
 0x573   :  { %1663 = vmatprep.subr.bf16.mxu0 %v2954_v25  ;;  %1704 = vmatprep.subr.bf16.mxu1 %v3024_v57 }
 0x615   :  { %v1371_v34 = vpop.f32.mrf.mxu0  ;;  %v1412_v46 = vpop.f32.mrf.mxu1 }
 0x616   :  { %v1423_v6 = vrot.slane %v1371_v34, 3  ;;  %v1427_v2 = vrot.slane %v1371_v34, 4  ;;  %v1425_v38 = vrot.slane %v1412_v46, 3  ;;  %v1429_v58 = vrot.slane %v1412_v46, 4 }
 0x617   :  { %v1373_v43 = vpop.f32.mrf.mxu0  ;;  %v1414_v26 = vpop.f32.mrf.mxu1 }
 0x618   :  { %v1439_v4 = vadd.f32 %v1423_v6, %v2767_v31  ;;  %v1443_v8 = vadd.f32 %v1427_v2, %v2773_v41  ;;  %v1424_v33 = vrot.slane %v1373_v43, 3  ;;  %v1428_v16 = vrot.slane %v1373_v43, 4 }
 0x619   :  { %v1375_v27 = vpop.f32.mrf.mxu0  ;;  %v1416_v18 = vpop.f32.mrf.mxu1  ;;  %v1441_v61 = vadd.f32 %v1425_v38, %v2779_v13  ;;  %v1445_v34 = vadd.f32 %v1429_v58, %v2781_v22  ;;  %v1426_v6 = vrot.slane %v1414_v26, 3  ;;  %v1430_v2 = vrot.slane %v1414_v26, 4 }
 0x61a   :  { %v1447_v36 = vmul.f32 0.5, %v1439_v4  ;;  %v1449_v45 = vmul.f32 0.5, %v1443_v8  ;;  %v1440_v25 = vadd.f32 %v1424_v33, %v2765_v29  ;;  %v1444_v57 = vadd.f32 %v1428_v16, %v2769_v32 }
 0x61b   :  { %v1376_v47 = vpop.f32.mrf.mxu0  ;;  %v1417_v3 = vpop.f32.mrf.mxu1  ;;  %v1442_v43 = vadd.f32 %v1426_v6, %v2784_v30  ;;  %v1446_v4 = vadd.f32 %v1430_v2, %v2787_v42 }
 0x61c   :  { %2344 = vtanh.f32 %v1447_v36  ;;  %v1448_v59 = vmul.f32 0.5, %v1440_v25  ;;  %v1450_v60 = vmul.f32 0.5, %v1444_v57  ;;  %v1475_v3 = vrot.slane %v3037_v12, 7 }
 0x61d   :  { %2346 = vtanh.f32 %v1449_v45  ;;  %v1465_v33 = vmul.f32 0.5, %v1442_v43  ;;  %v1466_v27 = vmul.f32 0.5, %v1446_v4 }
 0x61e   :  { %2348 = vtanh.f32 %v1448_v59 }
 0x61f   :  { %2350 = vtanh.f32 %v1450_v60  ;;  %v1476_v60 = vrot.slane %v3039_v28, 7 }
 0x620   :  { %2352 = vtanh.f32 %v1441_v61 }
 0x621   :  { %2354 = vtanh.f32 %v1445_v34 }
 0x622   :  { %2356 = vtanh.f32 %v1465_v33 }
 0x623   :  { %2358 = vtanh.f32 %v1466_v27 }
 0x629   :  { %v2345_v8 = vpop.eup %2344 }
 0x62a   :  { %v2347_v46 = vpop.eup %2346  ;;  %v1455_v16 = vadd.f32 1.0, %v2345_v8 }
 0x62b   :  { %v1457_v18 = vadd.f32 1.0, %v2347_v46  ;;  %v2349_v36 = vpop.eup %2348 }
 0x62c   :  { %v2351_v45 = vpop.eup %2350  ;;  %v1459_v38 = vmul.f32 0.5, %v1455_v16  ;;  %v1456_v25 = vadd.f32 1.0, %v2349_v36 }
 0x62d   :  { %v1461_v57 = vmul.f32 0.5, %v1457_v18  ;;  %v1458_v47 = vadd.f32 1.0, %v2351_v45  ;;  %v2353_v58 = vpop.eup %2352 }
 0x62e   :  { %v1460_v26 = vmul.f32 0.5, %v1456_v25  ;;  %v2355_v61 = vpop.eup %2354  ;;  %v1481_v6 = vmul.f32 %v2353_v58, %v1459_v38 }
 0x62f   :  { %v1462_v59 = vmul.f32 0.5, %v1458_v47  ;;  %v1482_v43 = vmul.f32 %v2355_v61, %v1461_v57  ;;  %v2357_v33 = vpop.eup %2356 }
 0x630   :  { %v1479_v34 = vmul.f32 %v1475_v3, %v1460_v26  ;;  %v2359_v46 = vpop.eup %2358  ;;  %v1469_v12 = vadd.f32 1.0, %v2357_v33 }
 0x631   :  { %v1480_v2 = vmul.f32 %v1476_v60, %v1462_v59  ;;  %v1470_v16 = vadd.f32 1.0, %v2359_v46 }
 0x632   :  { %v3110_v4 = vadd.f32 %v1481_v6, %v1479_v34  ;;  %v1471_v27 = vmul.f32 0.5, %v1469_v12 }
 0x633   :  { %v3112_v8 = vadd.f32 %v1482_v43, %v1480_v2  ;;  %v1472_v28 = vmul.f32 0.5, %v1470_v16 }
 0x634   :  { %2360 = vtanh.f32 %v3110_v4 }
 0x635   :  { %2362 = vtanh.f32 %v3112_v8 }
 0x641   :  { %v2361_v18 = vpop.eup %2360 }
 0x642   :  { %v2363_v36 = vpop.eup %2362  ;;  %v1487_v45 = vmul.f32 %v2361_v18, %v1471_v27 }
 0x643   :  { %v1488_v38 = vmul.f32 %v2363_v36, %v1472_v28  ;;  %v1638_v28 = vrot.slane %v3110_v4, 7 }
 0x644   :  { %v1489_v25 = vpack.c.bf16 %v1487_v45, %v1487_v45 }
 0x645   :  { %v1490_v57 = vpack.c.bf16 %v1488_v38, %v1488_v38  ;;  %v1639_v38 = vrot.slane %v3112_v8, 7 }
 0x646   :  { %v1493_v47 = vunpack.c.l.b16 %v1489_v25 }
 0x647   :  { %v1494_v26 = vunpack.c.l.b16 %v1490_v57 }
 0x648   :  { %v1495_v3 = vrot.slane %v1493_v47, 5 }
 0x649   :  { %v1496_v58 = vrot.slane %v1494_v26, 4 }
 0x64b   :  { %v1497_v59 = vsel %vm686_vm3, %v1496_v58, %v1495_v3 }
 0x64c   :  { %v1498_v60 = vpack.c.b16 %v1497_v59, %v1497_v59 }
 0x64e   :  { %1533 = vmatmul.mubr.bf16.vlgmr.msra.gmra.mxu0 %v1498_v60  ;;  %1574 = vmatmul.mubr.bf16.vlgmr.msra.gmra.mxu1 %v1498_v60 }
 0x64f   :  { %1664 = vmatpush1.bf16.msra.mxu0 %v2900_v11  ;;  %1705 = vmatpush1.bf16.msra.mxu1 %v2976_v40 }
 0x650   :  { %1665 = vmatprep.subr.bf16.mxu0 %v2904_v14  ;;  %1706 = vmatprep.subr.bf16.mxu1 %v2980_v44 }
 0x651   :  { %1695 = vmatprep.mubr.bf16.mxu0 %v3209_v37  ;;  %1736 = vmatprep.mubr.bf16.mxu1 %v3209_v37  ;;  %v3210_v37 = vmov 0.0  }
 0x653   :  { %1666 = vmatpush1.bf16.msra.mxu0 %v2910_v15  ;;  %1707 = vmatpush1.bf16.msra.mxu1 %v2986_v7 }
 0x654   :  { %1667 = vmatprep.subr.bf16.mxu0 %v2914_v19  ;;  %1708 = vmatprep.subr.bf16.mxu1 %v2990_v20 }
 0x657   :  { %1668 = vmatpush1.bf16.msra.mxu0 %v2918_v49  ;;  %1709 = vmatpush1.bf16.msra.mxu1 %v3055_v24 }
 0x658   :  { %1669 = vmatprep.subr.bf16.mxu0 %v2922_v50  ;;  %1710 = vmatprep.subr.bf16.mxu1 %v3059_v62 }
 0x65b   :  { %1670 = vmatpush1.bf16.msra.mxu0 %v2926_v21  ;;  %1711 = vmatpush1.bf16.msra.mxu1 %v3063_v10 }
 0x65c   :  { %1671 = vmatprep.subr.bf16.mxu0 %v2930_v51  ;;  %1712 = vmatprep.subr.bf16.mxu1 %v3067_v39 }
 0x65f   :  { %1672 = vmatpush1.bf16.msra.mxu0 %v2934_v52  ;;  %1713 = vmatpush1.bf16.msra.mxu1 %v3071_v9 }
 0x660   :  { %1673 = vmatprep.subr.bf16.mxu0 %v2938_v17  ;;  %1714 = vmatprep.subr.bf16.mxu1 %v3075_v48 }
 0x663   :  { %1674 = vmatpush1.bf16.msra.mxu0 %v2942_v23  ;;  %1715 = vmatpush1.bf16.msra.mxu1 %v3079_v1 }
 0x664   :  { %1675 = vmatprep.subr.bf16.mxu0 %v3007_v53  ;;  %1716 = vmatprep.subr.bf16.mxu1 %v3083_v63 }
 0x667   :  { %1676 = vmatpush1.bf16.msra.mxu0 %v3011_v54  ;;  %1717 = vmatpush1.bf16.msra.mxu1 %v3087_v5 }
 0x668   :  { %1677 = vmatprep.subr.bf16.mxu0 %v3015_v55  ;;  %1718 = vmatprep.subr.bf16.mxu1 %v3091_v35 }
 0x66b   :  { %1678 = vmatpush1.bf16.msra.mxu0 %v3019_v56  ;;  %1719 = vmatpush1.bf16.msra.mxu1 %v3095_v0 }
 0x66c   :  { %2121 = vmatprep.subr.bf16.mxu0 %v3210_v37 }
 0x70e   :  { %v1534_v11 = vpop.f32.mrf.mxu0  ;;  %v1575_v14 = vpop.f32.mrf.mxu1 }
 0x70f   :  { %v1586_v15 = vrot.slane %v1534_v11, 2  ;;  %v1590_v19 = vrot.slane %v1534_v11, 3  ;;  %v1588_v20 = vrot.slane %v1575_v14, 2  ;;  %v1592_v24 = vrot.slane %v1575_v14, 3 }
 0x710   :  { %v1536_v49 = vpop.f32.mrf.mxu0  ;;  %v1577_v50 = vpop.f32.mrf.mxu1 }
 0x711   :  { %v1602_v21 = vadd.f32 %v1586_v15, %v2767_v31  ;;  %v1606_v51 = vadd.f32 %v1590_v19, %v2773_v41  ;;  %v1587_v52 = vrot.slane %v1536_v49, 2  ;;  %v1591_v17 = vrot.slane %v1536_v49, 3 }
 0x712   :  { %v1538_v23 = vpop.f32.mrf.mxu0  ;;  %v1579_v40 = vpop.f32.mrf.mxu1  ;;  %v1604_v39 = vadd.f32 %v1588_v20, %v2779_v13  ;;  %v1608_v9 = vadd.f32 %v1592_v24, %v2781_v22  ;;  %v1589_v48 = vrot.slane %v1577_v50, 2  ;;  %v1593_v1 = vrot.slane %v1577_v50, 3  ;;  %v2240_v24 = vld [vmem:[#allocation10 + $0x18] sm:$0xff]  }
 0x713   :  { %v1610_v44 = vmul.f32 0.5, %v1602_v21  ;;  %v1612_v7 = vmul.f32 0.5, %v1606_v51  ;;  %v1603_v53 = vadd.f32 %v1587_v52, %v2765_v29  ;;  %v1607_v54 = vadd.f32 %v1591_v17, %v2769_v32 }
 0x714   :  { %v1539_v55 = vpop.f32.mrf.mxu0  ;;  %v1580_v56 = vpop.f32.mrf.mxu1  ;;  %v1605_v63 = vadd.f32 %v1589_v48, %v2784_v30  ;;  %v1609_v5 = vadd.f32 %v1593_v1, %v2787_v42 }
 0x715   :  { %2364 = vtanh.f32 %v1610_v44  ;;  %v1611_v62 = vmul.f32 0.5, %v1603_v53  ;;  %v1613_v10 = vmul.f32 0.5, %v1607_v54  ;;  %v2236_v53 = vld [vmem:[#allocation10 + $0x38] sm:$0xff]   ;;  %v2237_v54 = vld [vmem:[#allocation10 + $0x30] sm:$0xff]   ;;  %v2238_v55 = vld [vmem:[#allocation10 + $0x28] sm:$0xff]  }
 0x716   :  { %2366 = vtanh.f32 %v1612_v7  ;;  %v1628_v0 = vmul.f32 0.5, %v1605_v63  ;;  %v1629_v6 = vmul.f32 0.5, %v1609_v5  ;;  %v2239_v56 = vld [vmem:[#allocation10 + $0x20] sm:$0xff]  }
 0x717   :  { %2368 = vtanh.f32 %v1611_v62  ;;  %v2241_v62 = vld [vmem:[#allocation10 + $0x10] sm:$0xff]  }
 0x718   :  { %2370 = vtanh.f32 %v1613_v10  ;;  %v2242_v10 = vld [vmem:[#allocation10 + $0x8] sm:$0xff]  }
 0x719   :  { %2372 = vtanh.f32 %v1604_v39  ;;  %v2243_v39 = vld [vmem:[#allocation10] sm:$0xff]  }
 0x71a   :  { %2374 = vtanh.f32 %v1608_v9 }
 0x71b   :  { %2376 = vtanh.f32 %v1628_v0 }
 0x71c   :  { %2378 = vtanh.f32 %v1629_v6 }
 0x722   :  { %v2365_v35 = vpop.eup %2364 }
 0x723   :  { %v2367_v61 = vpop.eup %2366  ;;  %v1618_v34 = vadd.f32 1.0, %v2365_v35 }
 0x724   :  { %v1620_v2 = vadd.f32 1.0, %v2367_v61  ;;  %v2369_v43 = vpop.eup %2368 }
 0x725   :  { %v2371_v33 = vpop.eup %2370  ;;  %v1622_v46 = vmul.f32 0.5, %v1618_v34  ;;  %v1619_v12 = vadd.f32 1.0, %v2369_v43 }
 0x726   :  { %v1624_v16 = vmul.f32 0.5, %v1620_v2  ;;  %v1621_v27 = vadd.f32 1.0, %v2371_v33  ;;  %v2373_v36 = vpop.eup %2372 }
 0x727   :  { %v1623_v18 = vmul.f32 0.5, %v1619_v12  ;;  %v2375_v25 = vpop.eup %2374  ;;  %v1644_v47 = vmul.f32 %v2373_v36, %v1622_v46 }
 0x728   :  { %v1625_v45 = vmul.f32 0.5, %v1621_v27  ;;  %v1645_v3 = vmul.f32 %v2375_v25, %v1624_v16  ;;  %v2377_v60 = vpop.eup %2376 }
 0x729   :  { %v1642_v57 = vmul.f32 %v1638_v28, %v1623_v18  ;;  %v2379_v11 = vpop.eup %2378  ;;  %v1632_v4 = vadd.f32 1.0, %v2377_v60 }
 0x72a   :  { %v1643_v26 = vmul.f32 %v1639_v38, %v1625_v45  ;;  %v1633_v14 = vadd.f32 1.0, %v2379_v11 }
 0x72b   :  { %v3160_v58 = vadd.f32 %v1644_v47, %v1642_v57  ;;  %v1634_v15 = vmul.f32 0.5, %v1632_v4 }
 0x72c   :  { %v3162_v59 = vadd.f32 %v1645_v3, %v1643_v26  ;;  %v1635_v8 = vmul.f32 0.5, %v1633_v14 }
 0x72d   :  { %2380 = vtanh.f32 %v3160_v58 }
 0x72e   :  { %2382 = vtanh.f32 %v3162_v59 }
 0x73a   :  { %v2381_v19 = vpop.eup %2380 }
 0x73b   :  { %v2383_v49 = vpop.eup %2382  ;;  %v1650_v50 = vmul.f32 %v2381_v19, %v1634_v15 }
 0x73c   :  { %v1651_v21 = vmul.f32 %v2383_v49, %v1635_v8  ;;  %v1801_v49 = vrot.slane %v3160_v58, 7 }
 0x73d   :  { %v1652_v51 = vpack.c.bf16 %v1650_v50, %v1650_v50 }
 0x73e   :  { %v1653_v52 = vpack.c.bf16 %v1651_v21, %v1651_v21 }
 0x73f   :  { %v1656_v17 = vunpack.c.l.b16 %v1652_v51 }
 0x740   :  { %v1657_v23 = vunpack.c.l.b16 %v1653_v52 }
 0x741   :  { %v1658_v40 = vrot.slane %v1656_v17, 6 }
 0x742   :  { %v1659_v44 = vrot.slane %v1657_v23, 5 }
 0x744   :  { %v1660_v7 = vsel %vm686_vm3, %v1659_v44, %v1658_v40 }
 0x745   :  { %v1661_v20 = vpack.c.b16 %v1660_v7, %v1660_v7 }
 0x747   :  { %1696 = vmatmul.mubr.bf16.vlgmr.msra.gmra.mxu0 %v1661_v20  ;;  %1737 = vmatmul.mubr.bf16.vlgmr.msra.gmra.mxu1 %v1661_v20 }
 0x748   :  { %2122 = vmatpush3.bf16.msra.mxu0 %v2236_v53  ;;  %2137 = vmatprep.mubr.msk.bf16.mxu0 %vm2557_vm4, %v3210_v37 }
 0x749   :  { %2123 = vmatprep.subr.bf16.mxu0 %v3210_v37 }
 0x74c   :  { %2124 = vmatpush3.bf16.msra.mxu0 %v2237_v54  ;;  %v2558_v54 = vmov 1966171168  }
 0x74d   :  { %2125 = vmatprep.subr.bf16.mxu0 %v3210_v37  ;;  %v1820_v58 = vunpack.c.l.s4 %v2558_v54 }
 0x750   :  { %2126 = vmatpush3.bf16.msra.mxu0 %v2238_v55 }
 0x751   :  { %2127 = vmatprep.subr.bf16.mxu0 %v3210_v37 }
 0x754   :  { %2128 = vmatpush3.bf16.msra.mxu0 %v2239_v56 }
 0x755   :  { %2129 = vmatprep.subr.bf16.mxu0 %v3210_v37 }
 0x758   :  { %2130 = vmatpush3.bf16.msra.mxu0 %v2240_v24  ;;  %v1821_v24 = vunpack.c.0.s8 %v1820_v58 }
 0x759   :  { %2131 = vmatprep.subr.bf16.mxu0 %v3210_v37 }
 0x75c   :  { %2132 = vmatpush3.bf16.msra.mxu0 %v2241_v62 }
 0x75d   :  { %2133 = vmatprep.subr.bf16.mxu0 %v3210_v37 }
 0x760   :  { %2134 = vmatpush3.bf16.msra.mxu0 %v2242_v10 }
 0x761   :  { %2135 = vmatprep.subr.bf16.mxu0 %v3210_v37 }
 0x764   :  { %2136 = vmatpush3.bf16.msra.mxu0 %v2243_v39 }
 0x807   :  { %v1697_v9 = vpop.f32.mrf.mxu0  ;;  %v1738_v48 = vpop.f32.mrf.mxu1 }
 0x808   :  { %v1749_v1 = vrot.slane %v1697_v9, 1  ;;  %v1753_v63 = vrot.slane %v1697_v9, 2  ;;  %v1751_v12 = vrot.slane %v1738_v48, 1  ;;  %v1755_v28 = vrot.slane %v1738_v48, 2  ;;  %v3211_v48 = vld [vmem:[#allocation17_spill] sm:$0xff] }
 0x809   :  { %v1699_v5 = vpop.f32.mrf.mxu0  ;;  %v1740_v35 = vpop.f32.mrf.mxu1 }
 0x80a   :  { %v1765_v0 = vadd.f32 %v1749_v1, %v2767_v31  ;;  %v1769_v61 = vadd.f32 %v1753_v63, %v2773_v41  ;;  %v1750_v34 = vrot.slane %v1699_v5, 1  ;;  %v1754_v6 = vrot.slane %v1699_v5, 2 }
 0x80b   :  { %v1701_v2 = vpop.f32.mrf.mxu0  ;;  %v1742_v43 = vpop.f32.mrf.mxu1  ;;  %v1767_v41 = vadd.f32 %v1751_v12, %v2779_v13  ;;  %v1771_v45 = vadd.f32 %v1755_v28, %v2781_v22  ;;  %v1752_v38 = vrot.slane %v1740_v35, 1  ;;  %v1756_v25 = vrot.slane %v1740_v35, 2 }
 0x80c   :  { %v1773_v33 = vmul.f32 0.5, %v1765_v0  ;;  %v1775_v46 = vmul.f32 0.5, %v1769_v61  ;;  %v1766_v16 = vadd.f32 %v1750_v34, %v2765_v29  ;;  %v1770_v37 = vadd.f32 %v1754_v6, %v2769_v32 }
 0x80d   :  { %v1702_v27 = vpop.f32.mrf.mxu0  ;;  %v1743_v18 = vpop.f32.mrf.mxu1  ;;  %v1768_v29 = vadd.f32 %v1752_v38, %v2784_v30  ;;  %v1772_v32 = vadd.f32 %v1756_v25, %v2787_v42  ;;  %v1802_v42 = vrot.slane %v3162_v59, 7  ;;  %v1824_v1 = vsub.s32 %v1821_v24, %v3211_v48 }
 0x80e   :  { %2384 = vtanh.f32 %v1773_v33  ;;  %v1774_v36 = vmul.f32 0.5, %v1766_v16  ;;  %v1776_v31 = vmul.f32 0.5, %v1770_v37  ;;  %v2559_v63 = vmov 1935823168  }
 0x80f   :  { %2386 = vtanh.f32 %v1775_v46  ;;  %v1791_v47 = vmul.f32 0.5, %v1768_v29  ;;  %v1792_v60 = vmul.f32 0.5, %v1772_v32  ;;  %v1852_v5 = vunpack.c.l.s4 %v2559_v63 }
 0x810   :  { %2388 = vtanh.f32 %v1774_v36 }
 0x811   :  { %2390 = vtanh.f32 %v1776_v31  ;;  %v1853_v6 = vunpack.c.0.s8 %v1852_v5 }
 0x812   :  { %2392 = vtanh.f32 %v1767_v41 }
 0x813   :  { %2394 = vtanh.f32 %v1771_v45  ;;  %v1856_v18 = vsub.s32 %v1853_v6, %v3211_v48 }
 0x814   :  { %2396 = vtanh.f32 %v1791_v47 }
 0x815   :  { %2398 = vtanh.f32 %v1792_v60 }
 0x81b   :  { %v2385_v57 = vpop.eup %2384 }
 0x81c   :  { %v2387_v26 = vpop.eup %2386  ;;  %v1781_v3 = vadd.f32 1.0, %v2385_v57 }
 0x81d   :  { %v1783_v11 = vadd.f32 1.0, %v2387_v26  ;;  %v2389_v4 = vpop.eup %2388 }
 0x81e   :  { %v2391_v13 = vpop.eup %2390  ;;  %v1785_v14 = vmul.f32 0.5, %v1781_v3  ;;  %v1782_v15 = vadd.f32 1.0, %v2389_v4  ;;  %v2102_v4 = vld [vmem:[%s3200_s5] ss:$0 sm:$0xff] }
 0x81f   :  { %v1787_v22 = vmul.f32 0.5, %v1783_v11  ;;  %v1784_v19 = vadd.f32 1.0, %v2391_v13  ;;  %v2393_v30 = vpop.eup %2392 }
 0x820   :  { %v1786_v8 = vmul.f32 0.5, %v1782_v15  ;;  %v2395_v21 = vpop.eup %2394  ;;  %v1807_v52 = vmul.f32 %v2393_v30, %v1785_v14 }
 0x821   :  { %v1788_v50 = vmul.f32 0.5, %v1784_v19  ;;  %v1808_v23 = vmul.f32 %v2395_v21, %v1787_v22  ;;  %v2397_v20 = vpop.eup %2396 }
 0x822   :  { %v1805_v51 = vmul.f32 %v1801_v49, %v1786_v8  ;;  %v2399_v53 = vpop.eup %2398  ;;  %v1795_v55 = vadd.f32 1.0, %v2397_v20 }
 0x823   :  { %v1806_v17 = vmul.f32 %v1802_v42, %v1788_v50  ;;  %v1796_v56 = vadd.f32 1.0, %v2399_v53 }
 0x824   :  { %v1809_v40 = vadd.f32 %v1807_v52, %v1805_v51  ;;  %v1797_v59 = vmul.f32 0.5, %v1795_v55 }
 0x825   :  { %v1810_v44 = vadd.f32 %v1808_v23, %v1806_v17  ;;  %v1798_v10 = vmul.f32 0.5, %v1796_v56 }
 0x826   :  { %2400 = vtanh.f32 %v1809_v40  ;;  %1905 = vst [vmem:[#allocation3 - $0x7] sm:$0x80] %v1809_v40 }
 0x827   :  { %2402 = vtanh.f32 %v1810_v44  ;;  %v1902_v7 = vrot.slane %v1810_v44, 7 }
 0x829   :  { %1906 = vst [vmem:[#allocation3 + $0x1] sm:$0x1] %v1902_v7 }
 0x833   :  { %v2401_v62 = vpop.eup %2400 }
 0x834   :  { %v2403_v39 = vpop.eup %2402  ;;  %v1813_v9 = vmul.f32 %v2401_v62, %v1797_v59 }
 0x835   :  { %v1814_v35 = vmul.f32 %v2403_v39, %v1798_v10 }
 0x836   :  { %v1815_v0 = vpack.c.bf16 %v1813_v9, %v1813_v9 }
 0x837   :  { %v1816_v61 = vpack.c.bf16 %v1814_v35, %v1814_v35 }
 0x838   :  { %v1825_v34 = vrot.slane %v1815_v0, %v1824_v1  ;;  %v1933_v2 = vunpack.c.l.b16 %v1815_v0 }
 0x839   :  { %v1841_v43 = vrot.slane %v1816_v61, %v1824_v1  ;;  %v1934_v33 = vunpack.c.l.b16 %v1816_v61 }
 0x83a   :  { %v1826_v46 = vcombine.high %v1825_v34, %v1825_v34  ;;  %v1935_v12 = vrot.slane %v1933_v2, 7 }
 0x83b   :  { %v1842_v16 = vcombine.high %v1841_v43, %v1841_v43  ;;  %v1936_v37 = vrot.slane %v1934_v33, 6 }
 0x83c   :  { %v1833_v27 = vrot.slane %v1826_v46, %v1824_v1 }
 0x83d   :  { %v1849_v28 = vrot.slane %v1842_v16, %v1824_v1  ;;  %v1937_v36 = vsel %vm686_vm3, %v1936_v37, %v1935_v12 }
 0x83e   :  { %v1834_v31 = vcombine.high %v1833_v27, %v1833_v27  ;;  %v1938_v41 = vpack.c.b16 %v1937_v36, %v1937_v36 }
 0x83f   :  { %v1850_v45 = vcombine.high %v1849_v28, %v1849_v28 }
 0x840   :  { %v1857_v38 = vrot.slane %v1834_v31, %v1856_v18  ;;  %2138 = vmatmul.mubr.bf16.vlgmr.msra.gmra.mxu0 %v1938_v41 }
 0x841   :  { %v1871_v25 = vrot.slane %v1850_v45, %v1856_v18 }
 0x842   :  { %v1864_v29 = vrot.slane %v1857_v38, %v1856_v18 }
 0x843   :  { %v1878_v32 = vrot.slane %v1871_v25, %v1856_v18 }
 0x844   :  { %v1879_v57 = vunpack.c.l.b16 %v1864_v29 }
 0x845   :  { %v1880_v47 = vunpack.c.l.b16 %v1878_v32 }
 0x846   :  { %v1881_v26 = vrot.slane %v1879_v57, 1 }
 0x848   :  { %v1882_v3 = vsel %vm686_vm3, %v1880_v47, %v1881_v26 }
 0x849   :  { %v1883_v60 = vpack.c.b16 %v1882_v3, %v1882_v3 }
 0x84b   :  { %v1890_v11 = vrot.slane %v1883_v60, %v1824_v1 }
 0x84d   :  { %2101 = vst.sshfl [vmem:[#allocation2] sm:$0x1 pattern:$0x73625140] %v1890_v11 }
 0x900   :  { %v2022_v13 = vpop.f32.mrf.mxu0 }
 0x901   :  { %v2023_v14 = vadd.f32 %v2102_v4, %v2022_v13 }
 0x902   :  { %v2139_v15 = vpop.f32.mrf.mxu0 }
 0x903   :  { %2028 = vst [vmem:[#allocation12] sm:$0x3] %v2023_v14 }
 0x904   :  { %v2025_v22 = vpop.f32.mrf.mxu0 }
 0x905   :  { %2527 = shalt.err (!%p2524_p10)
}
 0x906   :  { %2038 = dma.vmem_to_hbm [thread:$0]  %s2036_s23, 32, %s3201_s6, [#allocation6]   ;;  %v2140_v19 = vpop.f32.mrf.mxu0 }
 0x907   :  { %2542 = dma.done.wait [#allocation6], 32  }
 0x908   :  { %2543 = vsyncadd [#allocation6], 4294967264 }
 0x909   :  { %2042 = vsyncpa [#allocation5], 1 }
 0x90a   :  { %2043 = vsyncpa [#allocation8], 1 }
 0x90b   :  { %2044 = vsyncpa [#allocation11], 1 }
 0x90c   :  { %2045 = vsyncpa [#allocation6], 1 }

</bundles_post_ra>
